<compile_context>
chip_gen: v7x
topology: tpu7x:2x2x1
jax: 0.10.0
libtpu: 0.0.40
codegen_flags: <defaults>
</compile_context>

<pallas_src>
import numpy as np
import jax
import jax.numpy as jnp
from jax.experimental import pallas as pl
from jax.experimental.pallas import tpu as pltpu

# ---------------- small synthetic shapes consistent with the forward ----------------
B = 2                 # batch
CIN = 8               # backbone.num_channels[-1]
H = W = 16            # backbone feature spatial size
HW = H * W            # 256 -> lane-dense
HIDDEN = 64           # transformer.d_model
N_GROUPS = 32         # GroupNorm(32, hidden)
BERT_HIDDEN = 96      # bert hidden size (synthetic)
L_TEXT = 8            # tokenized caption length
NQ = 16               # num_queries
N_DEC = 3             # transformer.num_decoder_layers
MAX_TEXT_LEN = 256
M_ROWS = N_DEC * B * NQ          # 96 flattened (layer, batch, query) rows
PAD_L = 128                      # lane-padded text width (first half of MAX_TEXT_LEN)
PAD_BOX = 128                    # lane-padded box-delta width (first 4 cols are real)
GN_EPS = 1e-5
INV_SIG_EPS = 1e-3
BOX_THRESHOLD = 0.45
TEXT_THRESHOLD = 0.45


# ======================= kernel 1: 1x1 conv + GroupNorm(32), fused =================
def input_proj_kernel(x_ref, w_ref, b_ref, gamma_ref, beta_ref, gavg_ref, o_ref):
    # x: (B, CIN, HW) f32   w: (HIDDEN, CIN) bf16   b/gamma/beta: (HIDDEN, 1) f32
    # gavg: (HIDDEN, HIDDEN) f32 group-averaging matrix (1/(chan_per_group*HW) blocks)
    w = w_ref[...]
    gavg = gavg_ref[...]
    bias = b_ref[...]
    gamma = gamma_ref[...]
    beta = beta_ref[...]
    for b in range(B):                                         # static unroll (B=2)
        x = x_ref[b].astype(jnp.bfloat16)                      # (CIN, HW)
        y = jnp.dot(w, x, preferred_element_type=jnp.float32) + bias   # (HIDDEN, HW)
        # group statistics via averaging-matrix matmul + lane reduction
        mean_c = jnp.sum(jnp.dot(gavg, y, preferred_element_type=jnp.float32),
                         axis=1, keepdims=True)                # (HIDDEN, 1)
        ex2_c = jnp.sum(jnp.dot(gavg, y * y, preferred_element_type=jnp.float32),
                        axis=1, keepdims=True)                 # (HIDDEN, 1)
        var_c = jnp.maximum(ex2_c - mean_c * mean_c, 0.0)      # clamp (biased var)
        y_n = (y - mean_c) * jax.lax.rsqrt(var_c + GN_EPS)
        o_ref[b] = y_n * gamma + beta                          # (HIDDEN, HW) lane-dense


def input_proj(x_nchw, w_hc, b_c, gamma, beta, g_avg):
    # x_nchw: (B, CIN, H, W) -> out: (B, HIDDEN, H, W); no transposes, only reshapes.
    x = x_nchw.reshape(B, CIN, HW)
    out = pl.pallas_call(
        input_proj_kernel,
        out_shape=jax.ShapeDtypeStruct((B, HIDDEN, HW), jnp.float32),
        grid=(1,),
        in_specs=[
            pl.BlockSpec((B, CIN, HW), lambda i: (0, 0, 0)),
            pl.BlockSpec((HIDDEN, CIN), lambda i: (0, 0)),
            pl.BlockSpec((HIDDEN, 1), lambda i: (0, 0)),
            pl.BlockSpec((HIDDEN, 1), lambda i: (0, 0)),
            pl.BlockSpec((HIDDEN, 1), lambda i: (0, 0)),
            pl.BlockSpec((HIDDEN, HIDDEN), lambda i: (0, 0)),
        ],
        out_specs=pl.BlockSpec((B, HIDDEN, HW), lambda i: (0, 0, 0)),
        compiler_params=pltpu.CompilerParams(dimension_semantics=("arbitrary",)),
    )(x, w_hc, b_c, gamma, beta, g_avg)
    return out.reshape(B, HIDDEN, H, W)


# ========== kernel 2: fused feat_map + bbox MLP refine + ContrastiveEmbed ==========
def head_kernel(bert_ref, fmw_ref, fmb_ref, hs_ref, ref_ref,
                w1_ref, b1_ref, w2_ref, b2_ref, w3_ref, b3_ref,
                sel_ref, bias_ref,
                et_ref, coord_ref, logit_ref):
    # --- feat_map: (B*L, BERT_HIDDEN) @ (BERT_HIDDEN, HIDDEN) ---
    et = jnp.dot(bert_ref[...].astype(jnp.bfloat16), fmw_ref[...],
                 preferred_element_type=jnp.float32) + fmb_ref[...]      # (B*L, HIDDEN)
    et_ref[...] = et

    # --- shared bbox MLP over all N_DEC*B*NQ rows at once (M=96), lane-padded N ---
    hsb = hs_ref[...].astype(jnp.bfloat16)                               # (96, HIDDEN)
    h = jnp.dot(hsb, w1_ref[...], preferred_element_type=jnp.float32) + b1_ref[...]
    h = jnp.maximum(h, 0.0)
    h = jnp.dot(h.astype(jnp.bfloat16), w2_ref[...],
                preferred_element_type=jnp.float32) + b2_ref[...]
    h = jnp.maximum(h, 0.0)
    delta = jnp.dot(h.astype(jnp.bfloat16), w3_ref[...],
                    preferred_element_type=jnp.float32) + b3_ref[...]    # (96, PAD_BOX)
    r = jnp.clip(ref_ref[...], 0.0, 1.0)
    x1 = jnp.maximum(r, INV_SIG_EPS)
    x2 = jnp.maximum(1.0 - r, INV_SIG_EPS)
    coord_ref[...] = jax.nn.sigmoid(delta + jnp.log(x1 / x2))            # (96, PAD_BOX)

    # --- ContrastiveEmbed: hs @ encoded_text^T, -inf on masked / padded tokens ---
    # upper half [128:256] is always -inf (pad-to-max_text_len)
    logit_ref[:, PAD_L:MAX_TEXT_LEN] = jnp.full(
        (M_ROWS, MAX_TEXT_LEN - PAD_L), -jnp.inf, jnp.float32)
    et_b16 = et.astype(jnp.bfloat16)                                     # (B*L, HIDDEN)
    for l in range(N_DEC):                                               # static unroll
        for b in range(B):
            row0 = (l * B + b) * NQ
            hs_lb = hsb[row0:row0 + NQ]                                  # (NQ, HIDDEN)
            # similarity against all B*L text tokens (A @ B^T contraction)
            res = jax.lax.dot_general(
                hs_lb, et_b16, (((1,), (1,)), ((), ())),
                preferred_element_type=jnp.float32)                      # (NQ, B*L)
            # select batch-b columns and place them at lanes [0, L_TEXT) via a 0/1
            # selection matmul (exact in f32); mask/pad handled by additive -inf bias
            slab = jnp.dot(res, sel_ref[b],
                           preferred_element_type=jnp.float32) + bias_ref[b]  # (NQ,128)
            logit_ref[row0:row0 + NQ, 0:PAD_L] = slab


def fused_head(bert_flat, fm_w, fm_b, hs_flat, ref_pad, bbox_params, sel, text_bias):
    w1, b1, w2, b2, w3p, b3p = bbox_params
    return pl.pallas_call(
        head_kernel,
        out_shape=(
            jax.ShapeDtypeStruct((B * L_TEXT, HIDDEN), jnp.float32),      # encoded_text
            jax.ShapeDtypeStruct((M_ROWS, PAD_BOX), jnp.float32),         # coords (pad)
            jax.ShapeDtypeStruct((M_ROWS, MAX_TEXT_LEN), jnp.float32),    # logits
        ),
        grid=(1,),
        in_specs=[
            pl.BlockSpec((B * L_TEXT, BERT_HIDDEN), lambda i: (0, 0)),
            pl.BlockSpec((BERT_HIDDEN, HIDDEN), lambda i: (0, 0)),
            pl.BlockSpec((1, HIDDEN), lambda i: (0, 0)),
            pl.BlockSpec((M_ROWS, HIDDEN), lambda i: (0, 0)),
            pl.BlockSpec((M_ROWS, PAD_BOX), lambda i: (0, 0)),
            pl.BlockSpec((HIDDEN, HIDDEN), lambda i: (0, 0)),
            pl.BlockSpec((1, HIDDEN), lambda i: (0, 0)),
            pl.BlockSpec((HIDDEN, HIDDEN), lambda i: (0, 0)),
            pl.BlockSpec((1, HIDDEN), lambda i: (0, 0)),
            pl.BlockSpec((HIDDEN, PAD_BOX), lambda i: (0, 0)),
            pl.BlockSpec((1, PAD_BOX), lambda i: (0, 0)),
            pl.BlockSpec((B, B * L_TEXT, PAD_L), lambda i: (0, 0, 0)),
            pl.BlockSpec((B, 1, PAD_L), lambda i: (0, 0, 0)),
        ],
        out_specs=(
            pl.BlockSpec((B * L_TEXT, HIDDEN), lambda i: (0, 0)),
            pl.BlockSpec((M_ROWS, PAD_BOX), lambda i: (0, 0)),
            pl.BlockSpec((M_ROWS, MAX_TEXT_LEN), lambda i: (0, 0)),
        ),
        compiler_params=pltpu.CompilerParams(dimension_semantics=("arbitrary",)),
    )(bert_flat, fm_w, fm_b, hs_flat, ref_pad, w1, b1, w2, b2, w3p, b3p, sel, text_bias)


# ================================ parameter init ====================================
def xavier_uniform(key, shape, fan_in, fan_out):
    bound = float(np.sqrt(6.0 / (fan_in + fan_out)))
    return jax.random.uniform(key, shape, jnp.float32, -bound, bound)


def make_params(key):
    ks = jax.random.split(key, 8)
    # input_proj: Conv2d(CIN, HIDDEN, 1) xavier_uniform weight (stored as (out,in),
    # bf16 for the MXU), zero bias; GN affine 1/0
    conv_w = xavier_uniform(ks[0], (HIDDEN, CIN), CIN, HIDDEN).astype(jnp.bfloat16)
    conv_b = jnp.zeros((HIDDEN, 1), jnp.float32)
    gamma = jnp.ones((HIDDEN, 1), jnp.float32)
    beta = jnp.zeros((HIDDEN, 1), jnp.float32)
    # group-averaging matrix: 1/(chan_per_group*HW) for channels in the same group
    gs = HIDDEN // N_GROUPS
    grp = jnp.arange(HIDDEN) // gs
    g_avg = (grp[:, None] == grp[None, :]).astype(jnp.float32) / float(gs * HW)
    # feat_map: xavier_uniform weight, zero bias
    fm_w = xavier_uniform(ks[1], (BERT_HIDDEN, HIDDEN),
                          BERT_HIDDEN, HIDDEN).astype(jnp.bfloat16)
    fm_b = jnp.zeros((1, HIDDEN), jnp.float32)
    # bbox MLP (shared across decoder layers); last layer constant-0 per __init__,
    # lane-padded to 128 output columns (only [:, :4] are real)
    w1 = xavier_uniform(ks[2], (HIDDEN, HIDDEN), HIDDEN, HIDDEN).astype(jnp.bfloat16)
    b1 = (0.01 * jax.random.normal(ks[3], (1, HIDDEN))).astype(jnp.float32)
    w2 = xavier_uniform(ks[4], (HIDDEN, HIDDEN), HIDDEN, HIDDEN).astype(jnp.bfloat16)
    b2 = (0.01 * jax.random.normal(ks[5], (1, HIDDEN))).astype(jnp.float32)
    w3p = jnp.zeros((HIDDEN, PAD_BOX), jnp.bfloat16)
    b3p = jnp.zeros((1, PAD_BOX), jnp.float32)
    # selection matrix: for batch b, places columns [b*L, b*L+L) of (hs @ et^T)
    # at output lanes [0, L)
    sel_np = np.zeros((B, B * L_TEXT, PAD_L), np.float32)
    for b in range(B):
        sel_np[b, b * L_TEXT + np.arange(L_TEXT), np.arange(L_TEXT)] = 1.0
    sel = jnp.asarray(sel_np)
    return dict(conv_w=conv_w, conv_b=conv_b, gamma=gamma, beta=beta, g_avg=g_avg,
                fm_w=fm_w, fm_b=fm_b, bbox=(w1, b1, w2, b2, w3p, b3p), sel=sel)


# ================================ forward (glue) ====================================
def grounding_dino_forward(features_nchw, bert_last_hidden, text_token_mask,
                           hs, reference, params):
    # TODO(synk): tokenizer / BERT / Swin backbone / deformable transformer are
    # external injected modules; their outputs are synthetic inputs here.
    # 1) input_proj over backbone features (num_feature_levels = 1)
    srcs = input_proj(features_nchw, params["conv_w"], params["conv_b"],
                      params["gamma"], params["beta"], params["g_avg"])

    # 2-4) fused head: feat_map + bbox refinement + ContrastiveEmbed
    bert_flat = bert_last_hidden.reshape(B * L_TEXT, BERT_HIDDEN)
    hs_flat = hs.reshape(M_ROWS, HIDDEN)
    ref_flat = reference[:N_DEC].reshape(M_ROWS, 4)
    ref_pad = jnp.concatenate(
        [ref_flat, jnp.full((M_ROWS, PAD_BOX - 4), 0.5, jnp.float32)], axis=1)
    mask_pad = jnp.zeros((B, PAD_L), jnp.bool_).at[:, :L_TEXT].set(text_token_mask)
    text_bias = jnp.where(mask_pad, 0.0, -jnp.inf).astype(jnp.float32)[:, None, :]

    et_flat, coord_pad, logit_flat = fused_head(
        bert_flat, params["fm_w"], params["fm_b"], hs_flat, ref_pad,
        params["bbox"], params["sel"], text_bias)

    encoded_text = et_flat.reshape(B, L_TEXT, HIDDEN)
    outputs_coord = coord_pad[:, :4].reshape(N_DEC, B, NQ, 4)
    outputs_class = logit_flat.reshape(N_DEC, B, NQ, MAX_TEXT_LEN)

    pred_logits = outputs_class[-1]                                  # (B, NQ, 256)
    pred_boxes = outputs_coord[-1]                                   # (B, NQ, 4)
    # pred_features: query with max sigmoid(logits)[:, :, 1]  (matches torch code)
    logits_noun = jax.nn.sigmoid(pred_logits)[:, :, 1]               # (B, NQ)
    pred_indices = jnp.argmax(logits_noun, axis=1)                   # (B,)
    pred_features = hs[-1][jnp.arange(B), pred_indices]              # (B, HIDDEN)
    # text_mask padded to max_text_len
    text_mask = jnp.zeros((B, MAX_TEXT_LEN), jnp.bool_)
    text_mask = text_mask.at[:, :L_TEXT].set(text_token_mask)
    return {
        "pred_logits": pred_logits,
        "pred_boxes": pred_boxes,
        "pred_features": pred_features,
        "text_mask": text_mask,
        "srcs": srcs,
        "encoded_text": encoded_text,
        "outputs_class": outputs_class,
        "outputs_coord": outputs_coord,
    }


if __name__ == "__main__":
    key = jax.random.PRNGKey(0)
    k_feat, k_bert, k_hs, k_ref, k_par = jax.random.split(key, 5)

    # synthetic stand-ins for backbone / BERT / transformer outputs
    features = jax.random.normal(k_feat, (B, CIN, H, W), jnp.float32)        # NCHW
    bert_last_hidden = jax.random.normal(k_bert, (B, L_TEXT, BERT_HIDDEN), jnp.float32)
    text_token_mask = jnp.array([[True] * L_TEXT,
                                 [True] * (L_TEXT - 2) + [False] * 2])
    hs = jax.random.normal(k_hs, (N_DEC, B, NQ, HIDDEN), jnp.float32)
    reference = jax.random.uniform(k_ref, (N_DEC + 1, B, NQ, 4), jnp.float32,
                                   0.05, 0.95)

    params = make_params(k_par)
    out = grounding_dino_forward(features, bert_last_hidden, text_token_mask,
                                 hs, reference, params)
    out = jax.tree_util.tree_map(jax.block_until_ready, out)

    # host-side box / text threshold filtering (ragged -> python lists, as in torch)
    logits = np.asarray(jax.nn.sigmoid(out["pred_logits"]))                  # (B, NQ, 256)
    boxes = np.asarray(out["pred_boxes"])
    filt_masks = logits.max(axis=2) > BOX_THRESHOLD
    filt_outputs, filt_boxes, pred_phrases = [], [], []
    for b in range(B):
        fo = logits[b][filt_masks[b]]
        filt_outputs.append(fo)
        filt_boxes.append(boxes[b][filt_masks[b]])
        for row in fo:
            # TODO(synk): get_phrases_from_posmap_DisC needs the HF tokenizer;
            # emit the boolean posmap instead of a decoded phrase.
            pred_phrases.append(row > TEXT_THRESHOLD)

    assert out["pred_logits"].shape == (B, NQ, MAX_TEXT_LEN)
    assert out["pred_boxes"].shape == (B, NQ, 4)
    assert out["pred_features"].shape == (B, HIDDEN)
    assert out["text_mask"].shape == (B, MAX_TEXT_LEN)
    assert out["srcs"].shape == (B, HIDDEN, H, W)
    assert np.isfinite(np.asarray(out["pred_boxes"])).all()
    assert np.isfinite(np.asarray(out["srcs"])).all()
    print("KERNEL_OK")
</pallas_src>

<mosaic_0001>
module attributes {stable_mosaic.version = 11 : i64} {
  func.func @input_proj_kernel(%arg0: i32, %arg1: memref<2x8x256xf32, #tpu.memory_space<vmem>>, %arg2: memref<64x8xbf16, #tpu.memory_space<vmem>>, %arg3: memref<64x1xf32, #tpu.memory_space<vmem>>, %arg4: memref<64x1xf32, #tpu.memory_space<vmem>>, %arg5: memref<64x1xf32, #tpu.memory_space<vmem>>, %arg6: memref<64x64xf32, #tpu.memory_space<vmem>>, %arg7: memref<2x64x256xf32, #tpu.memory_space<vmem>>) attributes {dimension_semantics = [#tpu.dimension_semantics<arbitrary>], iteration_bounds = array<i64: 1>, scalar_prefetch = 0 : i64, scratch_operands = 0 : i64, tpu.core_type = #tpu.core_type<tc>, window_params = [{pipeline_mode = #tpu.pipeline_mode<synchronous>, transform_indices = @transform_0, window_bounds = array<i64: 2, 8, 256>}, {pipeline_mode = #tpu.pipeline_mode<synchronous>, transform_indices = @transform_1, window_bounds = array<i64: 64, 8>}, {pipeline_mode = #tpu.pipeline_mode<synchronous>, transform_indices = @transform_2, window_bounds = array<i64: 64, 1>}, {pipeline_mode = #tpu.pipeline_mode<synchronous>, transform_indices = @transform_3, window_bounds = array<i64: 64, 1>}, {pipeline_mode = #tpu.pipeline_mode<synchronous>, transform_indices = @transform_4, window_bounds = array<i64: 64, 1>}, {pipeline_mode = #tpu.pipeline_mode<synchronous>, transform_indices = @transform_5, window_bounds = array<i64: 64, 64>}, {pipeline_mode = #tpu.pipeline_mode<synchronous>, transform_indices = @transform_6, window_bounds = array<i64: 2, 64, 256>}]} {
    %c0 = arith.constant 0 : index
    %c0_0 = arith.constant 0 : index
    %0 = vector.load %arg2[%c0, %c0_0] : memref<64x8xbf16, #tpu.memory_space<vmem>>, vector<64x8xbf16>
    %c0_1 = arith.constant 0 : index
    %c0_2 = arith.constant 0 : index
    %1 = vector.load %arg6[%c0_1, %c0_2] : memref<64x64xf32, #tpu.memory_space<vmem>>, vector<64x64xf32>
    %c0_3 = arith.constant 0 : index
    %c0_4 = arith.constant 0 : index
    %2 = vector.load %arg3[%c0_3, %c0_4] : memref<64x1xf32, #tpu.memory_space<vmem>>, vector<64x1xf32>
    %c0_5 = arith.constant 0 : index
    %c0_6 = arith.constant 0 : index
    %3 = vector.load %arg4[%c0_5, %c0_6] : memref<64x1xf32, #tpu.memory_space<vmem>>, vector<64x1xf32>
    %c0_7 = arith.constant 0 : index
    %c0_8 = arith.constant 0 : index
    %4 = vector.load %arg5[%c0_7, %c0_8] : memref<64x1xf32, #tpu.memory_space<vmem>>, vector<64x1xf32>
    %c0_9 = arith.constant 0 : index
    %c0_10 = arith.constant 0 : index
    %c0_11 = arith.constant 0 : index
    %5 = vector.load %arg1[%c0_9, %c0_10, %c0_11] : memref<2x8x256xf32, #tpu.memory_space<vmem>>, vector<1x8x256xf32>
    %6 = vector.shape_cast %5 : vector<1x8x256xf32> to vector<8x256xf32>
    %7 = arith.truncf %6 : vector<8x256xf32> to vector<8x256xbf16>
    %cst = arith.constant dense<0.000000e+00> : vector<64x256xf32>
    %8 = tpu.matmul %0, %7, %cst {dimension_numbers = #tpu.dot_dimension_numbers<[1], [0], [0], [1], [0, 0, 1, 1], [], []>} : vector<64x8xbf16>, vector<8x256xbf16>, vector<64x256xf32> -> vector<64x256xf32>
    %9 = vector.broadcast %2 : vector<64x1xf32> to vector<64x256xf32>
    %10 = arith.addf %8, %9 : vector<64x256xf32>
    %cst_12 = arith.constant dense<0.000000e+00> : vector<64x256xf32>
    %11 = tpu.matmul %1, %10, %cst_12 {dimension_numbers = #tpu.dot_dimension_numbers<[1], [0], [0], [1], [0, 0, 1, 1], [], []>} : vector<64x64xf32>, vector<64x256xf32>, vector<64x256xf32> -> vector<64x256xf32>
    %cst_13 = arith.constant dense<0.000000e+00> : vector<64xf32>
    %12 = vector.multi_reduction <add>, %11, %cst_13 [1] : vector<64x256xf32> to vector<64xf32>
    %13 = vector.shape_cast %12 : vector<64xf32> to vector<64x1xf32>
    %14 = arith.mulf %10, %10 : vector<64x256xf32>
    %cst_14 = arith.constant dense<0.000000e+00> : vector<64x256xf32>
    %15 = tpu.matmul %1, %14, %cst_14 {dimension_numbers = #tpu.dot_dimension_numbers<[1], [0], [0], [1], [0, 0, 1, 1], [], []>} : vector<64x64xf32>, vector<64x256xf32>, vector<64x256xf32> -> vector<64x256xf32>
    %cst_15 = arith.constant dense<0.000000e+00> : vector<64xf32>
    %16 = vector.multi_reduction <add>, %15, %cst_15 [1] : vector<64x256xf32> to vector<64xf32>
    %17 = vector.shape_cast %16 : vector<64xf32> to vector<64x1xf32>
    %18 = arith.mulf %13, %13 : vector<64x1xf32>
    %19 = arith.subf %17, %18 : vector<64x1xf32>
    %cst_16 = arith.constant 0.000000e+00 : f32
    %20 = vector.broadcast %cst_16 : f32 to vector<64x1xf32>
    %21 = arith.maximumf %19, %20 : vector<64x1xf32>
    %22 = vector.broadcast %13 : vector<64x1xf32> to vector<64x256xf32>
    %23 = arith.subf %10, %22 : vector<64x256xf32>
    %cst_17 = arith.constant 9.99999974E-6 : f32
    %24 = vector.broadcast %cst_17 : f32 to vector<64x1xf32>
    %25 = arith.addf %21, %24 : vector<64x1xf32>
    %26 = math.rsqrt %25 : vector<64x1xf32>
    %27 = vector.broadcast %26 : vector<64x1xf32> to vector<64x256xf32>
    %28 = arith.mulf %23, %27 : vector<64x256xf32>
    %29 = vector.broadcast %3 : vector<64x1xf32> to vector<64x256xf32>
    %30 = arith.mulf %28, %29 : vector<64x256xf32>
    %31 = vector.broadcast %4 : vector<64x1xf32> to vector<64x256xf32>
    %32 = arith.addf %30, %31 : vector<64x256xf32>
    %c0_18 = arith.constant 0 : index
    %c0_19 = arith.constant 0 : index
    %c0_20 = arith.constant 0 : index
    %33 = vector.load %arg7[%c0_18, %c0_19, %c0_20] : memref<2x64x256xf32, #tpu.memory_space<vmem>>, vector<1x64x256xf32>
    %34 = vector.shape_cast %33 : vector<1x64x256xf32> to vector<64x256xf32>
    %35 = vector.shape_cast %32 : vector<64x256xf32> to vector<1x64x256xf32>
    tpu.vector_store %arg7[%c0_18, %c0_19, %c0_20], %35 {strides = array<i32>} : memref<2x64x256xf32, #tpu.memory_space<vmem>>, vector<1x64x256xf32>,
    %c1 = arith.constant 1 : index
    %c0_21 = arith.constant 0 : index
    %c0_22 = arith.constant 0 : index
    %36 = vector.load %arg1[%c1, %c0_21, %c0_22] : memref<2x8x256xf32, #tpu.memory_space<vmem>>, vector<1x8x256xf32>
    %37 = vector.shape_cast %36 : vector<1x8x256xf32> to vector<8x256xf32>
    %38 = arith.truncf %37 : vector<8x256xf32> to vector<8x256xbf16>
    %cst_23 = arith.constant dense<0.000000e+00> : vector<64x256xf32>
    %39 = tpu.matmul %0, %38, %cst_23 {dimension_numbers = #tpu.dot_dimension_numbers<[1], [0], [0], [1], [0, 0, 1, 1], [], []>} : vector<64x8xbf16>, vector<8x256xbf16>, vector<64x256xf32> -> vector<64x256xf32>
    %40 = vector.broadcast %2 : vector<64x1xf32> to vector<64x256xf32>
    %41 = arith.addf %39, %40 : vector<64x256xf32>
    %cst_24 = arith.constant dense<0.000000e+00> : vector<64x256xf32>
    %42 = tpu.matmul %1, %41, %cst_24 {dimension_numbers = #tpu.dot_dimension_numbers<[1], [0], [0], [1], [0, 0, 1, 1], [], []>} : vector<64x64xf32>, vector<64x256xf32>, vector<64x256xf32> -> vector<64x256xf32>
    %cst_25 = arith.constant dense<0.000000e+00> : vector<64xf32>
    %43 = vector.multi_reduction <add>, %42, %cst_25 [1] : vector<64x256xf32> to vector<64xf32>
    %44 = vector.shape_cast %43 : vector<64xf32> to vector<64x1xf32>
    %45 = arith.mulf %41, %41 : vector<64x256xf32>
    %cst_26 = arith.constant dense<0.000000e+00> : vector<64x256xf32>
    %46 = tpu.matmul %1, %45, %cst_26 {dimension_numbers = #tpu.dot_dimension_numbers<[1], [0], [0], [1], [0, 0, 1, 1], [], []>} : vector<64x64xf32>, vector<64x256xf32>, vector<64x256xf32> -> vector<64x256xf32>
    %cst_27 = arith.constant dense<0.000000e+00> : vector<64xf32>
    %47 = vector.multi_reduction <add>, %46, %cst_27 [1] : vector<64x256xf32> to vector<64xf32>
    %48 = vector.shape_cast %47 : vector<64xf32> to vector<64x1xf32>
    %49 = arith.mulf %44, %44 : vector<64x1xf32>
    %50 = arith.subf %48, %49 : vector<64x1xf32>
    %cst_28 = arith.constant 0.000000e+00 : f32
    %51 = vector.broadcast %cst_28 : f32 to vector<64x1xf32>
    %52 = arith.maximumf %50, %51 : vector<64x1xf32>
    %53 = vector.broadcast %44 : vector<64x1xf32> to vector<64x256xf32>
    %54 = arith.subf %41, %53 : vector<64x256xf32>
    %cst_29 = arith.constant 9.99999974E-6 : f32
    %55 = vector.broadcast %cst_29 : f32 to vector<64x1xf32>
    %56 = arith.addf %52, %55 : vector<64x1xf32>
    %57 = math.rsqrt %56 : vector<64x1xf32>
    %58 = vector.broadcast %57 : vector<64x1xf32> to vector<64x256xf32>
    %59 = arith.mulf %54, %58 : vector<64x256xf32>
    %60 = vector.broadcast %3 : vector<64x1xf32> to vector<64x256xf32>
    %61 = arith.mulf %59, %60 : vector<64x256xf32>
    %62 = vector.broadcast %4 : vector<64x1xf32> to vector<64x256xf32>
    %63 = arith.addf %61, %62 : vector<64x256xf32>
    %c1_30 = arith.constant 1 : index
    %c0_31 = arith.constant 0 : index
    %c0_32 = arith.constant 0 : index
    %64 = vector.load %arg7[%c1_30, %c0_31, %c0_32] : memref<2x64x256xf32, #tpu.memory_space<vmem>>, vector<1x64x256xf32>
    %65 = vector.shape_cast %64 : vector<1x64x256xf32> to vector<64x256xf32>
    %66 = vector.shape_cast %63 : vector<64x256xf32> to vector<1x64x256xf32>
    tpu.vector_store %arg7[%c1_30, %c0_31, %c0_32], %66 {strides = array<i32>} : memref<2x64x256xf32, #tpu.memory_space<vmem>>, vector<1x64x256xf32>,
    return
  }
  func.func @transform_0(%arg0: i32) -> (i32, i32, i32) {
    %c0_i32 = arith.constant 0 : i32
    %c0_i32_0 = arith.constant 0 : i32
    %c0_i32_1 = arith.constant 0 : i32
    %c0_i32_2 = arith.constant 0 : i32
    return %c0_i32, %c0_i32_0, %c0_i32_1 : i32, i32, i32
  }
  func.func @transform_1(%arg0: i32) -> (i32, i32) {
    %c0_i32 = arith.constant 0 : i32
    %c0_i32_0 = arith.constant 0 : i32
    %c0_i32_1 = arith.constant 0 : i32
    return %c0_i32, %c0_i32_0 : i32, i32
  }
  func.func @transform_2(%arg0: i32) -> (i32, i32) {
    %c0_i32 = arith.constant 0 : i32
    %c0_i32_0 = arith.constant 0 : i32
    %c0_i32_1 = arith.constant 0 : i32
    return %c0_i32, %c0_i32_0 : i32, i32
  }
  func.func @transform_3(%arg0: i32) -> (i32, i32) {
    %c0_i32 = arith.constant 0 : i32
    %c0_i32_0 = arith.constant 0 : i32
    %c0_i32_1 = arith.constant 0 : i32
    return %c0_i32, %c0_i32_0 : i32, i32
  }
  func.func @transform_4(%arg0: i32) -> (i32, i32) {
    %c0_i32 = arith.constant 0 : i32
    %c0_i32_0 = arith.constant 0 : i32
    %c0_i32_1 = arith.constant 0 : i32
    return %c0_i32, %c0_i32_0 : i32, i32
  }
  func.func @transform_5(%arg0: i32) -> (i32, i32) {
    %c0_i32 = arith.constant 0 : i32
    %c0_i32_0 = arith.constant 0 : i32
    %c0_i32_1 = arith.constant 0 : i32
    return %c0_i32, %c0_i32_0 : i32, i32
  }
  func.func @transform_6(%arg0: i32) -> (i32, i32, i32) {
    %c0_i32 = arith.constant 0 : i32
    %c0_i32_0 = arith.constant 0 : i32
    %c0_i32_1 = arith.constant 0 : i32
    %c0_i32_2 = arith.constant 0 : i32
    return %c0_i32, %c0_i32_0, %c0_i32_1 : i32, i32, i32
  }
}

</mosaic_0001>

<bundles_post_ra>
// kernel: tpu_custom_call.1
= control target key start
LH: loop header
LB: loop body
LE: loop exit
PB: predicated region body
PF: predicated region fallthrough
CT: control target
= control target key end

     0   :  { %vm142_vm0 = vcmask 1043456   ;;  %v1435_v4 = vmov 0   ;;  %vm129_vm1 = vcmask 64512   ;;  %s2163_s0 = inlined_call_operand.vmem [shape: f32[2,8,256], index: 0, kind: input, shape index: {}]   ;;  %s2164_s1 = inlined_call_operand.vmem [shape: bf16[64,8], index: 1, kind: input, shape index: {}]   ;;  %s2165_s2 = inlined_call_operand.vmem [shape: f32[64,1], index: 2, kind: input, shape index: {}]   ;;  %s2166_s3 = inlined_call_operand.vmem [shape: f32[64,1], index: 3, kind: input, shape index: {}]   ;;  %s2167_s4 = inlined_call_operand.vmem [shape: f32[64,1], index: 4, kind: input, shape index: {}]   ;;  %s2168_s5 = inlined_call_operand.vmem [shape: f32[64,64], index: 5, kind: input, shape index: {}]   ;;  %s2169_s6 = inlined_call_operand.hbm [shape: f32[2,64,256], index: 6, kind: output, shape index: {}]  }
   0x1   :  { %v66_v0 = vld [vmem:[%s2163_s0 + $0x8] sm:$0xff]  ;;  %v65_v1 = vld [vmem:[%s2163_s0] sm:$0xff]  ;;  %181 = vmatprep.mubr.bf16.mxu0 %v1435_v4  ;;  %1374 = vset.pattern.permute.xlu1 %v1435_v4  ;;  %v43_v7 = vld [vmem:[%s2165_s2 + $0x10] sm:$0xff] }
   0x2   :  { %v68_v2 = vpack.c.bf16 %v66_v0, %v66_v0  ;;  %v67_v3 = vpack.c.bf16 %v65_v1, %v65_v1  ;;  %1373 = vset.pattern.permute.xlu0 %v1435_v4  ;;  %v1489_v6 = vld [vmem:[%s2164_s1] sm:$0xff]   ;;  %81 = vperm.xlu1 %1374, %v43_v7   ;;  %v44_v9 = vld [vmem:[%s2165_s2 + $0x18] sm:$0xff]  ;;  %v42_v10 = vld [vmem:[%s2165_s2 + $0x8] sm:$0xff] }
   0x3   :  { %v41_v8 = vld [vmem:[%s2165_s2] sm:$0xff]  ;;  %v46_v11 = vld [vmem:[%s2165_s2 + $0x28] sm:$0xff] }
   0x4   :  { %1252 = vmatprep.subr.msk.bf16.mxu0 %vm142_vm0, %v68_v2  ;;  %v144_v5 = vsel %vm142_vm0, %v67_v3, 0  ;;  %71 = vperm.xlu0 %1373, %v41_v8   ;;  %v1512_v12 = vld [vmem:[%s2164_s1 + $0x8] sm:$0xff]   ;;  %v45_v13 = vld [vmem:[%s2165_s2 + $0x20] sm:$0xff] }
   0x5   :  { %150 = vmatpush1.bf16.msra.mxu0 %v144_v5 }
   0x6   :  { %86 = vperm.xlu1 %1374, %v44_v9  }
   0x8   :  { %1253 = vmatmul.mubr.msk.bf16.vlgmr.msra.gmra.mrb[0].mxu0 %vm129_vm1, %v1489_v6  ;;  %76 = vperm.xlu0 %1373, %v42_v10  }
   0x9   :  { %191 = vmatprep.mubr.bf16.mxu0 %v1435_v4 }
   0xa   :  { %11 = vsyncpa [#allocation3], 0  ;;  %96 = vperm.xlu1 %1374, %v46_v11   ;;  %v48_v14 = vld [vmem:[%s2165_s2 + $0x38] sm:$0xff]  ;;  %v47_v15 = vld [vmem:[%s2165_s2 + $0x30] sm:$0xff]  ;;  %v1436_v32 = vmov 0.0   ;;  %vm222_vm2 = vcmask 523264  }
   0xb   :  { %v49_v16 = vld [vmem:[%s2166_s3] sm:$0xff]  ;;  %v1532_v17 = vld [vmem:[%s2164_s1 + $0x10] sm:$0xff]   ;;  %v50_v18 = vld [vmem:[%s2166_s3 + $0x8] sm:$0xff]  ;;  %311 = vmatprep.mubr.f32.mxu1 %v1436_v32 }
   0xc   :  { %91 = vperm.xlu0 %1373, %v45_v13   ;;  %v51_v19 = vld [vmem:[%s2166_s3 + $0x10] sm:$0xff]  ;;  %v52_v20 = vld [vmem:[%s2166_s3 + $0x18] sm:$0xff]  ;;  %v53_v21 = vld [vmem:[%s2166_s3 + $0x20] sm:$0xff] }
   0xd   :  { %v1552_v22 = vld [vmem:[%s2164_s1 + $0x18] sm:$0xff]   ;;  %v55_v23 = vld [vmem:[%s2166_s3 + $0x30] sm:$0xff]  ;;  %v54_v24 = vld [vmem:[%s2166_s3 + $0x28] sm:$0xff] }
   0xe   :  { %106 = vperm.xlu1 %1374, %v48_v14   ;;  %v57_v25 = vld [vmem:[%s2167_s4] sm:$0xff]  ;;  %v56_v26 = vld [vmem:[%s2166_s3 + $0x38] sm:$0xff]  ;;  %v59_v27 = vld [vmem:[%s2167_s4 + $0x10] sm:$0xff] }
   0xf   :  { %v58_v28 = vld [vmem:[%s2167_s4 + $0x8] sm:$0xff]  ;;  %v61_v29 = vld [vmem:[%s2167_s4 + $0x20] sm:$0xff]  ;;  %v60_v30 = vld [vmem:[%s2167_s4 + $0x18] sm:$0xff] }
  0x10   :  { %1254 = vmatmul.mubr.msk.bf16.gmra.mrb[4].mxu0 %vm129_vm1, %v1512_v12  ;;  %101 = vperm.xlu0 %1373, %v47_v15   ;;  %v62_v31 = vld [vmem:[%s2167_s4 + $0x28] sm:$0xff] }
  0x11   :  { %201 = vmatprep.mubr.bf16.mxu0 %v1435_v4 }
  0x12   :  { %611 = vperm.xlu1 %1374, %v49_v16  }
  0x14   :  { %616 = vperm.xlu0 %1373, %v50_v18  }
  0x16   :  { %621 = vperm.xlu1 %1374, %v51_v19  }
  0x18   :  { %1255 = vmatmul.mubr.msk.bf16.gmra.mrb[8].mxu0 %vm129_vm1, %v1532_v17  ;;  %626 = vperm.xlu0 %1373, %v52_v20  }
  0x19   :  { %211 = vmatprep.mubr.bf16.mxu0 %v1435_v4 }
  0x1a   :  { %631 = vperm.xlu1 %1374, %v53_v21  }
  0x1c   :  { %641 = vperm.xlu0 %1373, %v55_v23  }
  0x1e   :  { %636 = vperm.xlu1 %1374, %v54_v24  }
  0x20   :  { %1256 = vmatmul.mubr.msk.bf16.gmra.mrb[12].mxu0 %vm129_vm1, %v1552_v22  ;;  %667 = vperm.xlu0 %1373, %v57_v25  }
  0x21   :  { %464 = vmatprep.mubr.f32.mxu0 %v1436_v32 }
  0x22   :  { %646 = vperm.xlu1 %1374, %v56_v26  }
  0x24   :  { %677 = vperm.xlu0 %1373, %v59_v27  }
  0x26   :  { %672 = vperm.xlu1 %1374, %v58_v28  }
  0x28   :  { %687 = vperm.xlu0 %1373, %v61_v29  }
  0x2a   :  { %682 = vperm.xlu1 %1374, %v60_v30  }
  0x2e   :  { %692 = vperm.xlu1 %1374, %v62_v31  }
  0x81   :  { %v1598_v42 = vpop.permute.xlu1 %81 }
  0x83   :  { %v1585_v33 = vpop.permute.xlu0 %71 }
  0x85   :  { %v1615_v54 = vpop.permute.xlu1 %86 }
  0x87   :  { %v1587_v36 = vpop.permute.xlu0 %76 }
  0x89   :  { %v1643_v10 = vpop.permute.xlu1 %96 }
  0x8b   :  { %v1641_v7 = vpop.permute.xlu0 %91 }
  0x8d   :  { %v1671_v31 = vpop.permute.xlu1 %106 }
  0x8f   :  { %v1669_v28 = vpop.permute.xlu0 %101 }
  0xdb   :  { %v183_v34 = vpop.f32.mrb[0].mxu0 }
  0xdc   :  { %v185_v35 = vpop.f32.mrb[1].mxu0  ;;  %v1593_v39 = vadd.f32 %v183_v34, %v1585_v33 }
  0xdd   :  { %v1590_v37 = vadd.f32 %v185_v35, %v1585_v33  ;;  %v187_v38 = vpop.f32.mrb[2].mxu0 }
  0xde   :  { %v1596_v40 = vadd.f32 %v187_v38, %v1587_v36  ;;  %v189_v41 = vpop.f32.mrb[3].mxu0  ;;  %v384_v48 = vmul.f32 %v1593_v39, %v1593_v39  ;;  %v1274_v38 = vld [vmem:[%s2163_s0 + $0x18] sm:$0xff] }
  0xdf   :  { %v1601_v43 = vadd.f32 %v189_v41, %v1587_v36  ;;  %v385_v45 = vmul.f32 %v1590_v37, %v1590_v37 }
  0xe0   :  { %v386_v44 = vmul.f32 %v1596_v40, %v1596_v40  ;;  %v1298_v49 = vpack.c.bf16 %v1596_v40, %v1593_v39 }
  0xe1   :  { %v387_v46 = vmul.f32 %v1601_v43, %v1601_v43  ;;  %v1296_v47 = vpack.c.bf16 %v1601_v43, %v1590_v37 }
  0xe2   :  { %v1314_v52 = vpack.c.bf16 %v386_v44, %v384_v48 }
  0xe3   :  { %v193_v50 = vpop.f32.mrb[4].mxu0  ;;  %1297 = vmatprep.subr.bf16.mxu1 %v1296_v47  ;;  %v1312_v51 = vpack.c.bf16 %v387_v46, %v385_v45  ;;  %v1273_v46 = vld [vmem:[%s2163_s0 + $0x10] sm:$0xff] }
  0xe4   :  { %v195_v53 = vpop.f32.mrb[5].mxu0  ;;  %1299 = vmatpush1.bf16.msra.mxu1 %v1298_v49  ;;  %v1621_v57 = vadd.f32 %v193_v50, %v1598_v42  ;;  %v741_v49 = vpack.c.bf16 %v1274_v38, %v1274_v38 }
  0xe5   :  { %v1618_v55 = vadd.f32 %v195_v53, %v1598_v42  ;;  %v197_v56 = vpop.f32.mrb[6].mxu0  ;;  %1313 = vmatprep.subr.bf16.mxu0 %v1312_v51  ;;  %v740_v53 = vpack.c.bf16 %v1273_v46, %v1273_v46 }
  0xe6   :  { %v1624_v58 = vadd.f32 %v197_v56, %v1615_v54  ;;  %v199_v59 = vpop.f32.mrb[7].mxu0  ;;  %1315 = vmatpush1.bf16.msra.mxu0 %v1314_v52  ;;  %v388_v1 = vmul.f32 %v1621_v57, %v1621_v57 }
  0xe7   :  { %v1627_v60 = vadd.f32 %v199_v59, %v1615_v54  ;;  %v389_v62 = vmul.f32 %v1618_v55, %v1618_v55 }
  0xe8   :  { %v390_v61 = vmul.f32 %v1624_v58, %v1624_v58  ;;  %v1302_v2 = vpack.c.bf16 %v1624_v58, %v1621_v57 }
  0xe9   :  { %v391_v63 = vmul.f32 %v1627_v60, %v1627_v60  ;;  %v1300_v0 = vpack.c.bf16 %v1627_v60, %v1618_v55 }
  0xea   :  { %v1318_v8 = vpack.c.bf16 %v390_v61, %v388_v1  ;;  %v1716_v1 = vld [vmem:[%s2168_s5 + $0x8] sm:$0xff] }
  0xeb   :  { %v203_v3 = vpop.f32.mrb[8].mxu0  ;;  %1301 = vmatprep.subr.bf16.mxu1 %v1300_v0  ;;  %v1316_v5 = vpack.c.bf16 %v391_v63, %v389_v62  ;;  %v1706_v63 = vld [vmem:[%s2168_s5] sm:$0xff]  ;;  %v743_v0 = vsel %vm142_vm0, %v740_v53, 0 }
  0xec   :  { %v205_v9 = vpop.f32.mrb[9].mxu0  ;;  %1303 = vmatpush1.bf16.msra.mxu1 %v1302_v2  ;;  %v1649_v14 = vadd.f32 %v203_v3, %v1641_v7  ;;  %v1727_v2 = vld [vmem:[%s2168_s5 + $0x10] sm:$0xff]  ;;  %v1738_v3 = vld [vmem:[%s2168_s5 + $0x18] sm:$0xff] }
  0xed   :  { %v1646_v11 = vadd.f32 %v205_v9, %v1641_v7  ;;  %v207_v13 = vpop.f32.mrb[10].mxu0  ;;  %1317 = vmatprep.subr.bf16.mxu0 %v1316_v5  ;;  %v1749_v5 = vld [vmem:[%s2168_s5 + $0x20] sm:$0xff]  ;;  %v1771_v9 = vld [vmem:[%s2168_s5 + $0x30] sm:$0xff] }
  0xee   :  { %v1652_v15 = vadd.f32 %v207_v13, %v1643_v10  ;;  %v209_v16 = vpop.f32.mrb[11].mxu0  ;;  %1319 = vmatpush1.bf16.msra.mxu0 %v1318_v8  ;;  %v392_v24 = vmul.f32 %v1649_v14, %v1649_v14  ;;  %v1760_v8 = vld [vmem:[%s2168_s5 + $0x28] sm:$0xff]  ;;  %v1782_v13 = vld [vmem:[%s2168_s5 + $0x38] sm:$0xff] }
  0xef   :  { %v1655_v18 = vadd.f32 %v209_v16, %v1643_v10  ;;  %v393_v20 = vmul.f32 %v1646_v11, %v1646_v11 }
  0xf0   :  { %v394_v19 = vmul.f32 %v1652_v15, %v1652_v15  ;;  %v1306_v25 = vpack.c.bf16 %v1652_v15, %v1649_v14 }
  0xf1   :  { %v395_v21 = vmul.f32 %v1655_v18, %v1655_v18  ;;  %v1304_v23 = vpack.c.bf16 %v1655_v18, %v1646_v11 }
  0xf2   :  { %v1322_v29 = vpack.c.bf16 %v394_v19, %v392_v24 }
  0xf3   :  { %v213_v26 = vpop.f32.mrb[12].mxu0  ;;  %1305 = vmatprep.subr.bf16.mxu1 %v1304_v23  ;;  %v1320_v27 = vpack.c.bf16 %v395_v21, %v393_v20 }
  0xf4   :  { %v215_v30 = vpop.f32.mrb[13].mxu0  ;;  %1307 = vmatpush1.bf16.msra.mxu1 %v1306_v25  ;;  %v1680_v41 = vadd.f32 %v213_v26, %v1669_v28 }
  0xf5   :  { %v1674_v34 = vadd.f32 %v215_v30, %v1669_v28  ;;  %v217_v35 = vpop.f32.mrb[14].mxu0  ;;  %1321 = vmatprep.subr.bf16.mxu0 %v1320_v27 }
  0xf6   :  { %v1683_v44 = vadd.f32 %v217_v35, %v1671_v31  ;;  %v219_v45 = vpop.f32.mrb[15].mxu0  ;;  %1323 = vmatpush1.bf16.msra.mxu0 %v1322_v29  ;;  %v396_v56 = vmul.f32 %v1680_v41, %v1680_v41 }
  0xf7   :  { %v1689_v47 = vadd.f32 %v219_v45, %v1671_v31  ;;  %v397_v50 = vmul.f32 %v1674_v34, %v1674_v34 }
  0xf8   :  { %v398_v48 = vmul.f32 %v1683_v44, %v1683_v44  ;;  %v1310_v59 = vpack.c.bf16 %v1683_v44, %v1680_v41 }
  0xf9   :  { %v399_v51 = vmul.f32 %v1689_v47, %v1689_v47  ;;  %v1308_v52 = vpack.c.bf16 %v1689_v47, %v1674_v34 }
  0xfa   :  { %v1326_v62 = vpack.c.bf16 %v398_v48, %v396_v56 }
  0xfb   :  { %1309 = vmatprep.subr.bf16.mxu1 %v1308_v52  ;;  %v1324_v61 = vpack.c.bf16 %v399_v51, %v397_v50 }
  0xfc   :  { %1311 = vmatpush1.bf16.msra.mxu1 %v1310_v59 }
  0xfd   :  { %1325 = vmatprep.subr.bf16.mxu0 %v1324_v61  ;;  %1275 = vmatprep.subr.msk.bf16.mxu1 %vm142_vm0, %v741_v49 }
  0xfe   :  { %1327 = vmatpush1.bf16.msra.mxu0 %v1326_v62 }
  0xff   :  { %1257 = vmatmul.mubr.msk.f32.vlgmr.msra.gmra.mrb[0].mxu1 %vm222_vm2, %v1706_v63 }
 0x100   :  { %317 = vmatprep.mubr.f32.mxu1 %v1436_v32  ;;  %749 = vmatpush1.bf16.msra.mxu1 %v743_v0 }
 0x101   :  { %1265 = vmatmul.mubr.msk.f32.vlgmr.msra.gmra.mrb[16].mxu0 %vm222_vm2, %v1706_v63 }
 0x102   :  { %470 = vmatprep.mubr.f32.mxu0 %v1436_v32 }
 0x103   :  { %1258 = vmatmul.mubr.msk.f32.gmra.mrb[2].mxu1 %vm222_vm2, %v1716_v1 }
 0x104   :  { %323 = vmatprep.mubr.f32.mxu1 %v1436_v32 }
 0x105   :  { %1266 = vmatmul.mubr.msk.f32.gmra.mrb[18].mxu0 %vm222_vm2, %v1716_v1 }
 0x106   :  { %476 = vmatprep.mubr.f32.mxu0 %v1436_v32 }
 0x107   :  { %1259 = vmatmul.mubr.msk.f32.gmra.mrb[4].mxu1 %vm222_vm2, %v1727_v2 }
 0x108   :  { %329 = vmatprep.mubr.f32.mxu1 %v1436_v32 }
 0x109   :  { %1267 = vmatmul.mubr.msk.f32.gmra.mrb[20].mxu0 %vm222_vm2, %v1727_v2 }
 0x10a   :  { %482 = vmatprep.mubr.f32.mxu0 %v1436_v32 }
 0x10b   :  { %1260 = vmatmul.mubr.msk.f32.gmra.mrb[6].mxu1 %vm222_vm2, %v1738_v3 }
 0x10c   :  { %335 = vmatprep.mubr.f32.mxu1 %v1436_v32 }
 0x10d   :  { %1268 = vmatmul.mubr.msk.f32.gmra.mrb[22].mxu0 %vm222_vm2, %v1738_v3 }
 0x10e   :  { %488 = vmatprep.mubr.f32.mxu0 %v1436_v32 }
 0x10f   :  { %1261 = vmatmul.mubr.msk.f32.gmra.mrb[8].mxu1 %vm222_vm2, %v1749_v5 }
 0x110   :  { %341 = vmatprep.mubr.f32.mxu1 %v1436_v32 }
 0x111   :  { %1269 = vmatmul.mubr.msk.f32.gmra.mrb[24].mxu0 %vm222_vm2, %v1749_v5 }
 0x112   :  { %494 = vmatprep.mubr.f32.mxu0 %v1436_v32 }
 0x113   :  { %1262 = vmatmul.mubr.msk.f32.gmra.mrb[10].mxu1 %vm222_vm2, %v1760_v8 }
 0x114   :  { %347 = vmatprep.mubr.f32.mxu1 %v1436_v32 }
 0x115   :  { %1270 = vmatmul.mubr.msk.f32.gmra.mrb[26].mxu0 %vm222_vm2, %v1760_v8 }
 0x116   :  { %500 = vmatprep.mubr.f32.mxu0 %v1436_v32 }
 0x117   :  { %1263 = vmatmul.mubr.msk.f32.gmra.mrb[12].mxu1 %vm222_vm2, %v1771_v9 }
 0x118   :  { %353 = vmatprep.mubr.f32.mxu1 %v1436_v32 }
 0x119   :  { %1271 = vmatmul.mubr.msk.f32.gmra.mrb[28].mxu0 %vm222_vm2, %v1771_v9 }
 0x11a   :  { %506 = vmatprep.mubr.f32.mxu0 %v1436_v32 }
 0x11b   :  { %1264 = vmatmul.mubr.msk.f32.gmra.mrb[14].mxu1 %vm222_vm2, %v1782_v13 }
 0x11c   :  { %780 = vmatprep.mubr.bf16.mxu1 %v1435_v4 }
 0x11d   :  { %1272 = vmatmul.mubr.msk.f32.gmra.mrb[30].mxu0 %vm222_vm2, %v1782_v13 }
 0x11e   :  { %885 = vmatprep.mubr.f32.mxu0 %v1436_v32 }
 0x11f   :  { %1276 = vmatmul.mubr.msk.bf16.vlgmr.msra.gmra.mrb[16].mxu1 %vm129_vm1, %v1489_v6 }
 0x120   :  { %790 = vmatprep.mubr.bf16.mxu1 %v1435_v4 }
 0x127   :  { %1277 = vmatmul.mubr.msk.bf16.gmra.mrb[20].mxu1 %vm129_vm1, %v1512_v12 }
 0x128   :  { %800 = vmatprep.mubr.bf16.mxu1 %v1435_v4 }
 0x12f   :  { %1278 = vmatmul.mubr.msk.bf16.gmra.mrb[24].mxu1 %vm129_vm1, %v1532_v17 }
 0x130   :  { %810 = vmatprep.mubr.bf16.mxu1 %v1435_v4 }
 0x137   :  { %1279 = vmatmul.mubr.msk.bf16.gmra.mrb[28].mxu1 %vm129_vm1, %v1552_v22 }
 0x138   :  { %1044 = vmatprep.mubr.f32.mxu1 %v1436_v32 }
 0x1d2   :  { %v313_v16 = vpop.f32.mrb[0].mxu1 }
 0x1d3   :  { %v315_v19 = vpop.f32.mrb[1].mxu1 }
 0x1d4   :  { %v360_v6 = vadd.f32 %v315_v19, %v313_v16  ;;  %v466_v20 = vpop.f32.mrb[16].mxu0 }
 0x1d5   :  { %v468_v21 = vpop.f32.mrb[17].mxu0 }
 0x1d6   :  { %v513_v23 = vadd.f32 %v468_v21, %v466_v20  ;;  %361 = vadd.xlane.f32.xlu0 %v360_v6  ;;  %v319_v12 = vpop.f32.mrb[2].mxu1 }
 0x1d7   :  { %v321_v24 = vpop.f32.mrb[3].mxu1 }
 0x1d8   :  { %v363_v25 = vadd.f32 %v321_v24, %v319_v12  ;;  %514 = vadd.xlane.f32.xlu1 %v513_v23  ;;  %v472_v26 = vpop.f32.mrb[18].mxu0 }
 0x1d9   :  { %v474_v17 = vpop.f32.mrb[19].mxu0 }
 0x1da   :  { %v516_v27 = vadd.f32 %v474_v17, %v472_v26  ;;  %v325_v4 = vpop.f32.mrb[4].mxu1 }
 0x1db   :  { %v327_v29 = vpop.f32.mrb[5].mxu1 }
 0x1dc   :  { %v366_v30 = vadd.f32 %v327_v29, %v325_v4  ;;  %517 = vadd.xlane.f32.xlu0 %v516_v27  ;;  %364 = vadd.xlane.f32.xlu1 %v363_v25  ;;  %v478_v22 = vpop.f32.mrb[20].mxu0 }
 0x1dd   :  { %v480_v35 = vpop.f32.mrb[21].mxu0 }
 0x1de   :  { %v331_v38 = vpop.f32.mrb[6].mxu1  ;;  %v519_v45 = vadd.f32 %v480_v35, %v478_v22 }
 0x1df   :  { %v333_v46 = vpop.f32.mrb[7].mxu1 }
 0x1e0   :  { %v369_v48 = vadd.f32 %v333_v46, %v331_v38  ;;  %367 = vadd.xlane.f32.xlu0 %v366_v30  ;;  %520 = vadd.xlane.f32.xlu1 %v519_v45  ;;  %v484_v49 = vpop.f32.mrb[22].mxu0 }
 0x1e1   :  { %v486_v50 = vpop.f32.mrb[23].mxu0 }
 0x1e2   :  { %v337_v51 = vpop.f32.mrb[8].mxu1  ;;  %v522_v52 = vadd.f32 %v486_v50, %v484_v49 }
 0x1e3   :  { %v339_v53 = vpop.f32.mrb[9].mxu1 }
 0x1e4   :  { %v372_v56 = vadd.f32 %v339_v53, %v337_v51  ;;  %370 = vadd.xlane.f32.xlu0 %v369_v48  ;;  %v490_v59 = vpop.f32.mrb[24].mxu0 }
 0x1e5   :  { %v492_v61 = vpop.f32.mrb[25].mxu0 }
 0x1e6   :  { %373 = vadd.xlane.f32.xlu1 %v372_v56  ;;  %v343_v62 = vpop.f32.mrb[10].mxu1  ;;  %v525_v0 = vadd.f32 %v492_v61, %v490_v59 }
 0x1e7   :  { %v345_v16 = vpop.f32.mrb[11].mxu1 }
 0x1e8   :  { %v375_v19 = vadd.f32 %v345_v16, %v343_v62  ;;  %523 = vadd.xlane.f32.xlu0 %v522_v52  ;;  %v496_v6 = vpop.f32.mrb[26].mxu0 }
 0x1e9   :  { %v498_v20 = vpop.f32.mrb[27].mxu0 }
 0x1ea   :  { %526 = vadd.xlane.f32.xlu1 %v525_v0  ;;  %v349_v21 = vpop.f32.mrb[12].mxu1  ;;  %v528_v23 = vadd.f32 %v498_v20, %v496_v6 }
 0x1eb   :  { %v351_v12 = vpop.f32.mrb[13].mxu1 }
 0x1ec   :  { %v378_v24 = vadd.f32 %v351_v12, %v349_v21  ;;  %376 = vadd.xlane.f32.xlu0 %v375_v19  ;;  %v502_v25 = vpop.f32.mrb[28].mxu0 }
 0x1ed   :  { %v504_v26 = vpop.f32.mrb[29].mxu0 }
 0x1ee   :  { %379 = vadd.xlane.f32.xlu1 %v378_v24  ;;  %v355_v17 = vpop.f32.mrb[14].mxu1  ;;  %v531_v27 = vadd.f32 %v504_v26, %v502_v25 }
 0x1ef   :  { %v357_v4 = vpop.f32.mrb[15].mxu1 }
 0x1f0   :  { %v381_v29 = vadd.f32 %v357_v4, %v355_v17  ;;  %529 = vadd.xlane.f32.xlu0 %v528_v23  ;;  %v508_v30 = vpop.f32.mrb[30].mxu0 }
 0x1f1   :  { %v510_v22 = vpop.f32.mrb[31].mxu0 }
 0x1f2   :  { %532 = vadd.xlane.f32.xlu1 %v531_v27  ;;  %v782_v35 = vpop.f32.mrb[16].mxu1  ;;  %v534_v38 = vadd.f32 %v510_v22, %v508_v30 }
 0x1f3   :  { %v784_v45 = vpop.f32.mrb[17].mxu1  ;;  %v1809_v49 = vadd.f32 %v782_v35, %v1585_v33 }
 0x1f4   :  { %v1806_v46 = vadd.f32 %v784_v45, %v1585_v33  ;;  %v786_v48 = vpop.f32.mrb[18].mxu1  ;;  %382 = vadd.xlane.f32.xlu0 %v381_v29 }
 0x1f5   :  { %2174 = vst [vmem:[#allocation6_spill] sm:$0xff] %v1809_v49  ;;  %v1812_v50 = vadd.f32 %v786_v48, %v1587_v36  ;;  %v788_v51 = vpop.f32.mrb[19].mxu1  ;;  %v958_v61 = vmul.f32 %v1809_v49, %v1809_v49 }
 0x1f6   :  { %2173 = vst [vmem:[#allocation5_spill] sm:$0xff] %v1806_v46  ;;  %v1815_v52 = vadd.f32 %v788_v51, %v1587_v36  ;;  %v959_v56 = vmul.f32 %v1806_v46, %v1806_v46 }
 0x1f7   :  { %v960_v53 = vmul.f32 %v1812_v50, %v1812_v50  ;;  %v1330_v36 = vpack.c.bf16 %v1812_v50, %v1809_v49 }
 0x1f8   :  { %v961_v59 = vmul.f32 %v1815_v52, %v1815_v52  ;;  %535 = vadd.xlane.f32.xlu0 %v534_v38  ;;  %v1328_v33 = vpack.c.bf16 %v1815_v52, %v1806_v46 }
 0x1f9   :  { %v1829_v16 = vpack.c.bf16 %v960_v53, %v958_v61 }
 0x1fa   :  { %v792_v62 = vpop.f32.mrb[20].mxu1  ;;  %1329 = vmatprep.subr.bf16.mxu0 %v1328_v33  ;;  %v1344_v0 = vpack.c.bf16 %v961_v59, %v959_v56 }
 0x1fb   :  { %v794_v19 = vpop.f32.mrb[21].mxu1  ;;  %1331 = vmatpush1.bf16.msra.mxu0 %v1330_v36  ;;  %v1835_v21 = vadd.f32 %v792_v62, %v1598_v42 }
 0x1fc   :  { %v1832_v6 = vadd.f32 %v794_v19, %v1598_v42  ;;  %v796_v20 = vpop.f32.mrb[22].mxu1  ;;  %1360 = vmatprep.subr.bf16.mxu1 %v1344_v0 }
 0x1fd   :  { %v1838_v23 = vadd.f32 %v796_v20, %v1615_v54  ;;  %v798_v12 = vpop.f32.mrb[23].mxu1  ;;  %1364 = vmatpush1.bf16.msra.mxu1 %v1829_v16  ;;  %v962_v27 = vmul.f32 %v1835_v21, %v1835_v21 }
 0x1fe   :  { %v1842_v24 = vadd.f32 %v798_v12, %v1615_v54  ;;  %v963_v26 = vmul.f32 %v1832_v6, %v1832_v6 }
 0x1ff   :  { %v964_v25 = vmul.f32 %v1838_v23, %v1838_v23  ;;  %v1334_v4 = vpack.c.bf16 %v1838_v23, %v1835_v21 }
 0x200   :  { %v965_v17 = vmul.f32 %v1842_v24, %v1842_v24  ;;  %v1332_v42 = vpack.c.bf16 %v1842_v24, %v1832_v6 }
 0x201   :  { %v1350_v30 = vpack.c.bf16 %v964_v25, %v962_v27 }
 0x202   :  { %v802_v54 = vpop.f32.mrb[24].mxu1  ;;  %1333 = vmatprep.subr.bf16.mxu0 %v1332_v42  ;;  %v1348_v29 = vpack.c.bf16 %v965_v17, %v963_v26 }
 0x203   :  { %v804_v22 = vpop.f32.mrb[25].mxu1  ;;  %1335 = vmatpush1.bf16.msra.mxu0 %v1334_v4  ;;  %v1860_v45 = vadd.f32 %v802_v54, %v1641_v7 }
 0x204   :  { %v1857_v35 = vadd.f32 %v804_v22, %v1641_v7  ;;  %v806_v38 = vpop.f32.mrb[26].mxu1  ;;  %1361 = vmatprep.subr.bf16.mxu1 %v1348_v29 }
 0x205   :  { %v1863_v48 = vadd.f32 %v806_v38, %v1643_v10  ;;  %v808_v51 = vpop.f32.mrb[27].mxu1  ;;  %1365 = vmatpush1.bf16.msra.mxu1 %v1350_v30  ;;  %v966_v61 = vmul.f32 %v1860_v45, %v1860_v45 }
 0x206   :  { %v1866_v53 = vadd.f32 %v808_v51, %v1643_v10  ;;  %v967_v59 = vmul.f32 %v1857_v35, %v1857_v35 }
 0x207   :  { %v968_v56 = vmul.f32 %v1863_v48, %v1863_v48  ;;  %v1338_v36 = vpack.c.bf16 %v1863_v48, %v1860_v45 }
 0x208   :  { %v969_v33 = vmul.f32 %v1866_v53, %v1866_v53  ;;  %v1336_v7 = vpack.c.bf16 %v1866_v53, %v1857_v35 }
 0x209   :  { %v1354_v19 = vpack.c.bf16 %v968_v56, %v966_v61 }
 0x20a   :  { %v812_v10 = vpop.f32.mrb[28].mxu1  ;;  %1337 = vmatprep.subr.bf16.mxu0 %v1336_v7  ;;  %v1352_v62 = vpack.c.bf16 %v969_v33, %v967_v59 }
 0x20b   :  { %v814_v20 = vpop.f32.mrb[29].mxu1  ;;  %1339 = vmatpush1.bf16.msra.mxu0 %v1338_v36  ;;  %v1884_v26 = vadd.f32 %v812_v10, %v1669_v28 }
 0x20c   :  { %v1881_v12 = vadd.f32 %v814_v20, %v1669_v28  ;;  %v816_v25 = vpop.f32.mrb[30].mxu1  ;;  %1362 = vmatprep.subr.bf16.mxu1 %v1352_v62 }
 0x20d   :  { %v1887_v17 = vadd.f32 %v816_v25, %v1671_v31  ;;  %v818_v42 = vpop.f32.mrb[31].mxu1  ;;  %1366 = vmatpush1.bf16.msra.mxu1 %v1354_v19  ;;  %v970_v38 = vmul.f32 %v1884_v26, %v1884_v26 }
 0x20e   :  { %v1890_v27 = vadd.f32 %v818_v42, %v1671_v31  ;;  %v971_v54 = vmul.f32 %v1881_v12, %v1881_v12 }
 0x20f   :  { %v972_v4 = vmul.f32 %v1887_v17, %v1887_v17  ;;  %v1342_v51 = vpack.c.bf16 %v1887_v17, %v1884_v26 }
 0x210   :  { %2175 = vst [vmem:[#allocation7_spill] sm:$0xff] %v1890_v27  ;;  %v973_v22 = vmul.f32 %v1890_v27, %v1890_v27  ;;  %v1340_v28 = vpack.c.bf16 %v1890_v27, %v1881_v12 }
 0x211   :  { %v1358_v56 = vpack.c.bf16 %v972_v4, %v970_v38 }
 0x212   :  { %1341 = vmatprep.subr.bf16.mxu0 %v1340_v28  ;;  %v1356_v31 = vpack.c.bf16 %v973_v22, %v971_v54 }
 0x213   :  { %1343 = vmatpush1.bf16.msra.mxu0 %v1342_v51 }
 0x214   :  { %1345 = vmatprep.subr.bf16.mxu0 %v1344_v0  ;;  %1363 = vmatprep.subr.bf16.mxu1 %v1356_v31 }
 0x215   :  { %1367 = vmatpush1.bf16.msra.mxu1 %v1358_v56 }
 0x216   :  { %1280 = vmatmul.mubr.msk.f32.vlgmr.msra.gmra.mrb[32].mxu0 %vm222_vm2, %v1706_v63 }
 0x217   :  { %1347 = vmatpush1.bf16.msra.mxu0 %v1829_v16  ;;  %891 = vmatprep.mubr.f32.mxu0 %v1436_v32 }
 0x218   :  { %1349 = vmatprep.subr.bf16.mxu0 %v1348_v29  ;;  %1289 = vmatmul.mubr.msk.f32.vlgmr.msra.gmra.mrb[32].mxu1 %vm222_vm2, %v1716_v1 }
 0x219   :  { %1050 = vmatprep.mubr.f32.mxu1 %v1436_v32 }
 0x21a   :  { %1281 = vmatmul.mubr.msk.f32.gmra.mrb[34].mxu0 %vm222_vm2, %v1716_v1  ;;  %v1951_v1 = vpop.permute.xlu1 %611 }
 0x21b   :  { %1351 = vmatpush1.bf16.msra.mxu0 %v1350_v30  ;;  %897 = vmatprep.mubr.f32.mxu0 %v1436_v32 }
 0x21c   :  { %1353 = vmatprep.subr.bf16.mxu0 %v1352_v62  ;;  %1290 = vmatmul.mubr.msk.f32.gmra.mrb[34].mxu1 %vm222_vm2, %v1727_v2 }
 0x21d   :  { %1056 = vmatprep.mubr.f32.mxu1 %v1436_v32 }
 0x21e   :  { %1282 = vmatmul.mubr.msk.f32.gmra.mrb[36].mxu0 %vm222_vm2, %v1727_v2  ;;  %v1953_v2 = vpop.permute.xlu1 %621 }
 0x21f   :  { %1355 = vmatpush1.bf16.msra.mxu0 %v1354_v19  ;;  %903 = vmatprep.mubr.f32.mxu0 %v1436_v32 }
 0x220   :  { %1357 = vmatprep.subr.bf16.mxu0 %v1356_v31  ;;  %1291 = vmatmul.mubr.msk.f32.gmra.mrb[36].mxu1 %vm222_vm2, %v1738_v3 }
 0x221   :  { %1062 = vmatprep.mubr.f32.mxu1 %v1436_v32 }
 0x222   :  { %1283 = vmatmul.mubr.msk.f32.gmra.mrb[38].mxu0 %vm222_vm2, %v1738_v3  ;;  %v1955_v3 = vpop.permute.xlu0 %616 }
 0x223   :  { %1359 = vmatpush1.bf16.msra.mxu0 %v1358_v56  ;;  %909 = vmatprep.mubr.f32.mxu0 %v1436_v32 }
 0x224   :  { %1292 = vmatmul.mubr.msk.f32.gmra.mrb[38].mxu1 %vm222_vm2, %v1749_v5 }
 0x225   :  { %1068 = vmatprep.mubr.f32.mxu1 %v1436_v32 }
 0x226   :  { %1284 = vmatmul.mubr.msk.f32.gmra.mrb[40].mxu0 %vm222_vm2, %v1749_v5  ;;  %v1957_v5 = vpop.permute.xlu1 %631 }
 0x227   :  { %915 = vmatprep.mubr.f32.mxu0 %v1436_v32 }
 0x228   :  { %1293 = vmatmul.mubr.msk.f32.gmra.mrb[40].mxu1 %vm222_vm2, %v1760_v8 }
 0x229   :  { %1074 = vmatprep.mubr.f32.mxu1 %v1436_v32 }
 0x22a   :  { %1285 = vmatmul.mubr.msk.f32.gmra.mrb[42].mxu0 %vm222_vm2, %v1760_v8  ;;  %v1959_v8 = vpop.permute.xlu0 %626 }
 0x22b   :  { %921 = vmatprep.mubr.f32.mxu0 %v1436_v32 }
 0x22c   :  { %1294 = vmatmul.mubr.msk.f32.gmra.mrb[42].mxu1 %vm222_vm2, %v1771_v9 }
 0x22d   :  { %1080 = vmatprep.mubr.f32.mxu1 %v1436_v32 }
 0x22e   :  { %1286 = vmatmul.mubr.msk.f32.gmra.mrb[44].mxu0 %vm222_vm2, %v1771_v9  ;;  %v1961_v9 = vpop.permute.xlu1 %636  ;;  %v1963_v0 = vpop.permute.xlu0 %641 }
 0x22f   :  { %927 = vmatprep.mubr.f32.mxu0 %v1436_v32 }
 0x230   :  { %1295 = vmatmul.mubr.msk.f32.gmra.mrb[44].mxu1 %vm222_vm2, %v1782_v13 }
 0x232   :  { %1287 = vmatmul.mubr.msk.f32.gmra.mrb[46].mxu0 %vm222_vm2, %v1782_v13  ;;  %v1965_v13 = vpop.permute.xlu1 %646 }
 0x233   :  { %1038 = vmatprep.mubr.f32.mxu0 %v1436_v32  ;;  %v1967_v32 = vpop.permute.xlu0 %667 }
 0x236   :  { %1288 = vmatmul.mubr.msk.f32.vlgmr.msra.gmra.mrb[48].mxu0 %vm222_vm2, %v1706_v63  ;;  %v1969_v16 = vpop.permute.xlu1 %672 }
 0x237   :  { %v1971_v63 = vpop.permute.xlu0 %677 }
 0x23a   :  { %v1973_v29 = vpop.permute.xlu1 %682 }
 0x23b   :  { %v1975_v30 = vpop.permute.xlu0 %687 }
 0x23e   :  { %v1977_v59 = vpop.permute.xlu1 %692 }
 0x263   :  { %v362_v33 = vpop.xlane.xlu0 %361 }
 0x264   :  { %v537_v7 = vmul.f32 %v362_v33, %v362_v33 }
 0x265   :  { %v515_v61 = vpop.xlane.xlu1 %514 }
 0x266   :  { %v545_v36 = vsub.f32 %v515_v61, %v537_v7 }
 0x268   :  { %v553_v10 = vmax.f32 %v545_v36, 0.0  ;;  %v561_v36 = vsub.f32 %v1593_v39, %v362_v33 }
 0x269   :  { %v518_v62 = vpop.xlane.xlu0 %517  ;;  %v365_v19 = vpop.xlane.xlu1 %364 }
 0x26a   :  { %v577_v20 = vadd.f32 1e-05, %v553_v10  ;;  %v538_v25 = vmul.f32 %v365_v19, %v365_v19  ;;  %v562_v10 = vsub.f32 %v1590_v37, %v362_v33 }
 0x26c   :  { %1379 = vrsqrt.f32 %v577_v20  ;;  %v546_v42 = vsub.f32 %v518_v62, %v538_v25 }
 0x26d   :  { %v368_v4 = vpop.xlane.xlu0 %367  ;;  %v521_v54 = vpop.xlane.xlu1 %520 }
 0x26e   :  { %v554_v22 = vmax.f32 %v546_v42, 0.0  ;;  %v539_v28 = vmul.f32 %v368_v4, %v368_v4 }
 0x270   :  { %v578_v38 = vadd.f32 1e-05, %v554_v22  ;;  %v547_v51 = vsub.f32 %v521_v54, %v539_v28 }
 0x271   :  { %v1979_v31 = vpop.xlane.xlu0 %370 }
 0x272   :  { %1381 = vrsqrt.f32 %v578_v38  ;;  %v555_v56 = vmax.f32 %v547_v51, 0.0  ;;  %v540_v61 = vmul.f32 %v1979_v31, %v1979_v31 }
 0x273   :  { %v1981_v46 = vpop.xlane.xlu1 %373 }
 0x274   :  { %v579_v7 = vadd.f32 1e-05, %v555_v56  ;;  %v541_v42 = vmul.f32 %v1981_v46, %v1981_v46 }
 0x275   :  { %v524_v62 = vpop.xlane.xlu0 %523 }
 0x276   :  { %v1380_v20 = vpop.eup %1379  ;;  %1383 = vrsqrt.f32 %v579_v7  ;;  %v548_v25 = vsub.f32 %v524_v62, %v540_v61  ;;  %v563_v61 = vsub.f32 %v1596_v40, %v365_v19  ;;  %v565_v40 = vsub.f32 %v1621_v57, %v368_v4 }
 0x277   :  { %v593_v54 = vmul.f32 %v1380_v20, %v561_v36  ;;  %v594_v22 = vmul.f32 %v1380_v20, %v562_v10  ;;  %v527_v28 = vpop.xlane.xlu1 %526  ;;  %v564_v36 = vsub.f32 %v1601_v43, %v365_v19  ;;  %v566_v43 = vsub.f32 %v1618_v55, %v368_v4 }
 0x278   :  { %v556_v38 = vmax.f32 %v548_v25, 0.0  ;;  %v549_v51 = vsub.f32 %v527_v28, %v541_v42  ;;  %v567_v4 = vsub.f32 %v1624_v58, %v1979_v31 }
 0x279   :  { %v649_v56 = vmul.f32 %v1951_v1, %v593_v54  ;;  %v650_v49 = vmul.f32 %v1951_v1, %v594_v22  ;;  %v1991_v27 = vpop.xlane.xlu0 %376 }
 0x27a   :  { %v580_v39 = vadd.f32 1e-05, %v556_v38  ;;  %v557_v37 = vmax.f32 %v549_v51, 0.0  ;;  %v542_v20 = vmul.f32 %v1991_v27, %v1991_v27 }
 0x27b   :  { %v705_v33 = vadd.f32 %v1967_v32, %v649_v56  ;;  %v706_v7 = vadd.f32 %v1967_v32, %v650_v49 }
 0x27c   :  { %v1382_v10 = vpop.eup %1381  ;;  %1385 = vrsqrt.f32 %v580_v39  ;;  %v581_v62 = vadd.f32 1e-05, %v557_v37 }
 0x27d   :  { %721 = vst [vmem:[#allocation2] sm:$0xff] %v705_v33  ;;  %722 = vst [vmem:[#allocation2 + $0x8] sm:$0xff] %v706_v7  ;;  %v595_v25 = vmul.f32 %v1382_v10, %v563_v61  ;;  %v596_v42 = vmul.f32 %v1382_v10, %v564_v36  ;;  %v530_v54 = vpop.xlane.xlu0 %529  ;;  %v568_v36 = vsub.f32 %v1627_v60, %v1979_v31 }
 0x27e   :  { %1387 = vrsqrt.f32 %v581_v62  ;;  %v550_v22 = vsub.f32 %v530_v54, %v542_v20  ;;  %v569_v62 = vsub.f32 %v1649_v14, %v1981_v46  ;;  %v570_v20 = vsub.f32 %v1646_v11, %v1981_v46 }
 0x27f   :  { %v651_v28 = vmul.f32 %v1955_v3, %v595_v25  ;;  %v652_v49 = vmul.f32 %v1955_v3, %v596_v42 }
 0x280   :  { %v1384_v19 = vpop.eup %1383  ;;  %v558_v38 = vmax.f32 %v550_v22, 0.0 }
 0x281   :  { %v707_v51 = vadd.f32 %v1969_v16, %v651_v28  ;;  %v708_v56 = vadd.f32 %v1969_v16, %v652_v49  ;;  %v597_v39 = vmul.f32 %v1384_v19, %v565_v40  ;;  %v598_v37 = vmul.f32 %v1384_v19, %v566_v43 }
 0x282   :  { %v582_v33 = vadd.f32 1e-05, %v558_v38  ;;  %v571_v43 = vsub.f32 %v1652_v15, %v1991_v27  ;;  %v572_v19 = vsub.f32 %v1655_v18, %v1991_v27 }
 0x283   :  { %723 = vst [vmem:[#allocation2 + $0x10] sm:$0xff] %v707_v51  ;;  %724 = vst [vmem:[#allocation2 + $0x18] sm:$0xff] %v708_v56  ;;  %v653_v7 = vmul.f32 %v1953_v2, %v597_v39  ;;  %v654_v61 = vmul.f32 %v1953_v2, %v598_v37 }
 0x284   :  { %1389 = vrsqrt.f32 %v582_v33 }
 0x285   :  { %v709_v57 = vadd.f32 %v1971_v63, %v653_v7  ;;  %v710_v55 = vadd.f32 %v1971_v63, %v654_v61 }
 0x286   :  { %v1386_v10 = vpop.eup %1385 }
 0x287   :  { %725 = vst [vmem:[#allocation2 + $0x20] sm:$0xff] %v709_v57  ;;  %726 = vst [vmem:[#allocation2 + $0x28] sm:$0xff] %v710_v55  ;;  %v599_v25 = vmul.f32 %v1386_v10, %v567_v4  ;;  %v600_v42 = vmul.f32 %v1386_v10, %v568_v36 }
 0x288   :  { %v1388_v54 = vpop.eup %1387 }
 0x289   :  { %v655_v22 = vmul.f32 %v1959_v8, %v599_v25  ;;  %v656_v28 = vmul.f32 %v1959_v8, %v600_v42  ;;  %v601_v58 = vmul.f32 %v1388_v54, %v569_v62  ;;  %v602_v49 = vmul.f32 %v1388_v54, %v570_v20 }
 0x28b   :  { %v711_v60 = vadd.f32 %v1973_v29, %v655_v22  ;;  %v712_v31 = vadd.f32 %v1973_v29, %v656_v28  ;;  %v657_v40 = vmul.f32 %v1957_v5, %v601_v58  ;;  %v658_v14 = vmul.f32 %v1957_v5, %v602_v49 }
 0x28d   :  { %727 = vst [vmem:[#allocation2 + $0x30] sm:$0xff] %v711_v60  ;;  %728 = vst [vmem:[#allocation2 + $0x38] sm:$0xff] %v712_v31  ;;  %v713_v11 = vadd.f32 %v1975_v30, %v657_v40  ;;  %v714_v46 = vadd.f32 %v1975_v30, %v658_v14 }
 0x28e   :  { %v1390_v38 = vpop.eup %1389 }
 0x28f   :  { %729 = vst [vmem:[#allocation2 + $0x40] sm:$0xff] %v713_v11  ;;  %730 = vst [vmem:[#allocation2 + $0x48] sm:$0xff] %v714_v46  ;;  %v603_v51 = vmul.f32 %v1390_v38, %v571_v43  ;;  %v604_v56 = vmul.f32 %v1390_v38, %v572_v19 }
 0x291   :  { %v659_v39 = vmul.f32 %v1961_v9, %v603_v51  ;;  %v660_v37 = vmul.f32 %v1961_v9, %v604_v56 }
 0x293   :  { %v715_v33 = vadd.f32 %v1977_v59, %v659_v39  ;;  %v716_v7 = vadd.f32 %v1977_v59, %v660_v37 }
 0x295   :  { %731 = vst [vmem:[#allocation2 + $0x50] sm:$0xff] %v715_v33  ;;  %732 = vst [vmem:[#allocation2 + $0x58] sm:$0xff] %v716_v7 }
 0x2e9   :  { %v887_v61 = vpop.f32.mrb[32].mxu0 }
 0x2ea   :  { %v889_v15 = vpop.f32.mrb[33].mxu0 }
 0x2eb   :  { %v934_v57 = vadd.f32 %v889_v15, %v887_v61  ;;  %v1046_v55 = vpop.f32.mrb[32].mxu1 }
 0x2ec   :  { %v1048_v18 = vpop.f32.mrb[33].mxu1 }
 0x2ed   :  { %935 = vadd.xlane.f32.xlu1 %v934_v57  ;;  %v893_v27 = vpop.f32.mrb[34].mxu0  ;;  %v1090_v4 = vadd.f32 %v1048_v18, %v1046_v55 }
 0x2ee   :  { %v895_v36 = vpop.f32.mrb[35].mxu0 }
 0x2ef   :  { %v937_v10 = vadd.f32 %v895_v36, %v893_v27  ;;  %v1052_v62 = vpop.f32.mrb[34].mxu1 }
 0x2f0   :  { %v1054_v20 = vpop.f32.mrb[35].mxu1 }
 0x2f1   :  { %938 = vadd.xlane.f32.xlu0 %v937_v10  ;;  %v1093_v25 = vadd.f32 %v1054_v20, %v1052_v62  ;;  %1091 = vadd.xlane.f32.xlu1 %v1090_v4  ;;  %v899_v42 = vpop.f32.mrb[36].mxu0 }
 0x2f2   :  { %v901_v54 = vpop.f32.mrb[37].mxu0 }
 0x2f3   :  { %v1058_v22 = vpop.f32.mrb[36].mxu1  ;;  %v940_v28 = vadd.f32 %v901_v54, %v899_v42 }
 0x2f4   :  { %v1060_v58 = vpop.f32.mrb[37].mxu1 }
 0x2f5   :  { %v1096_v49 = vadd.f32 %v1060_v58, %v1058_v22  ;;  %1094 = vadd.xlane.f32.xlu0 %v1093_v25  ;;  %v905_v60 = vpop.f32.mrb[38].mxu0  ;;  %v63_v58 = vld [vmem:[%s2167_s4 + $0x30] sm:$0xff] }
 0x2f6   :  { %v907_v31 = vpop.f32.mrb[39].mxu0 }
 0x2f7   :  { %1097 = vadd.xlane.f32.xlu1 %v1096_v49  ;;  %v943_v40 = vadd.f32 %v907_v31, %v905_v60  ;;  %v1064_v14 = vpop.f32.mrb[38].mxu1  ;;  %v2039_v49 = vpop.xlane.xlu1 %379 }
 0x2f8   :  { %v1066_v11 = vpop.f32.mrb[39].mxu1  ;;  %v2041_v60 = vpop.xlane.xlu0 %382 }
 0x2f9   :  { %941 = vadd.xlane.f32.xlu0 %v940_v28  ;;  %v1099_v46 = vadd.f32 %v1066_v11, %v1064_v14  ;;  %v911_v43 = vpop.f32.mrb[40].mxu0  ;;  %v64_v28 = vld [vmem:[%s2167_s4 + $0x38] sm:$0xff]  ;;  %v544_v14 = vmul.f32 %v2041_v60, %v2041_v60  ;;  %s1437_s4 = smov [#allocation2]  }
 0x2fa   :  { %v913_v19 = vpop.f32.mrb[41].mxu0  ;;  %s1237_s22 = sshll.u32 %s1437_s4, 4  ;;  %s1238_s22 = int_to_ptr.vmem [resolvable:$true] %s1237_s22 }
 0x2fb   :  { %v1070_v38 = vpop.f32.mrb[40].mxu1  ;;  %944 = vadd.xlane.f32.xlu1 %v943_v40  ;;  %v946_v51 = vadd.f32 %v913_v19, %v911_v43  ;;  %v533_v31 = vpop.xlane.xlu1 %532  ;;  %v543_v43 = vmul.f32 %v2039_v49, %v2039_v49  ;;  %s1411_s23 = scalar_lea.vmem %s1238_s22, 4096  ;;  %p1416_p1 = scmp.lt.s32.totalorder %s1238_s22, %s1238_s22 }
 0x2fc   :  { %v1072_v56 = vpop.f32.mrb[41].mxu1  ;;  %v536_v40 = vpop.xlane.xlu0 %535  ;;  %p1412_p0 = scmp.ne.s32.totalorder %s1238_s22, %s1411_s23  ;;  %p1417_p2 = scmp.lt.s32.totalorder %s1411_s23, %s1411_s23 }
 0x2fd   :  { %v1102_v39 = vadd.f32 %v1072_v56, %v1070_v38  ;;  %1100 = vadd.xlane.f32.xlu0 %v1099_v46  ;;  %v917_v37 = vpop.f32.mrb[42].mxu0  ;;  %v552_v11 = vsub.f32 %v536_v40, %v544_v14  ;;  %v551_v19 = vsub.f32 %v533_v31, %v543_v43 }
 0x2fe   :  { %v919_v33 = vpop.f32.mrb[43].mxu0  ;;  %p1418_p3 = por %p1417_p2, %p1416_p1 }
 0x2ff   :  { %1103 = vadd.xlane.f32.xlu1 %v1102_v39  ;;  %v949_v7 = vadd.f32 %v919_v33, %v917_v37  ;;  %v1076_v61 = vpop.f32.mrb[42].mxu1  ;;  %v560_v38 = vmax.f32 %v552_v11, 0.0  ;;  %v559_v37 = vmax.f32 %v551_v19, 0.0 }
 0x300   :  { %v1078_v15 = vpop.f32.mrb[43].mxu1  ;;  %p1419_p4 = pnand %p1418_p3, %p1412_p0 }
 0x301   :  { %947 = vadd.xlane.f32.xlu0 %v946_v51  ;;  %v1105_v57 = vadd.f32 %v1078_v15, %v1076_v61  ;;  %v923_v55 = vpop.f32.mrb[44].mxu0 }
 0x302   :  { %v925_v18 = vpop.f32.mrb[45].mxu0 }
 0x303   :  { %v1082_v27 = vpop.f32.mrb[44].mxu1  ;;  %950 = vadd.xlane.f32.xlu1 %v949_v7  ;;  %v952_v4 = vadd.f32 %v925_v18, %v923_v55  ;;  %v584_v7 = vadd.f32 1e-05, %v560_v38  ;;  %v583_v55 = vadd.f32 1e-05, %v559_v37  ;;  %v575_v37 = vsub.f32 %v1683_v44, %v2041_v60 }
 0x304   :  { %v1084_v36 = vpop.f32.mrb[45].mxu1 }
 0x305   :  { %v1108_v10 = vadd.f32 %v1084_v36, %v1082_v27  ;;  %1106 = vadd.xlane.f32.xlu0 %v1105_v57  ;;  %v929_v62 = vpop.f32.mrb[46].mxu0  ;;  %1391 = vrsqrt.f32 %v584_v7 }
 0x306   :  { %v931_v20 = vpop.f32.mrb[47].mxu0 }
 0x307   :  { %1109 = vadd.xlane.f32.xlu1 %v1108_v10  ;;  %v955_v25 = vadd.f32 %v931_v20, %v929_v62 }
 0x309   :  { %v1040_v42 = vpop.f32.mrb[48].mxu0  ;;  %953 = vadd.xlane.f32.xlu0 %v952_v4 }
 0x30a   :  { %v1042_v54 = vpop.f32.mrb[49].mxu0 }
 0x30b   :  { %v1087_v22 = vadd.f32 %v1042_v54, %v1040_v42  ;;  %956 = vadd.xlane.f32.xlu1 %v955_v25 }
 0x30d   :  { %1088 = vadd.xlane.f32.xlu0 %v1087_v22 }
 0x30f   :  { %v1392_v14 = vpop.eup %1391 }
 0x31c   :  { %702 = vperm.xlu1 %1374, %v64_v28  }
 0x323   :  { %697 = vperm.xlu0 %1373, %v63_v58  }
 0x37a   :  { %v2045_v46 = vpop.xlane.xlu1 %935 }
 0x37e   :  { %v939_v51 = vpop.xlane.xlu0 %938  ;;  %v1092_v39 = vpop.xlane.xlu1 %1091 }
 0x37f   :  { %v1112_v56 = vmul.f32 %v939_v51, %v939_v51  ;;  %v1137_v11 = vsub.f32 %v1812_v50, %v939_v51  ;;  %v1138_v43 = vsub.f32 %v1815_v52, %v939_v51  ;;  %v573_v50 = vsub.f32 %v1680_v41, %v2039_v49 }
 0x381   :  { %v1120_v33 = vsub.f32 %v1092_v39, %v1112_v56 }
 0x382   :  { %v1095_v61 = vpop.xlane.xlu0 %1094 }
 0x383   :  { %v1128_v15 = vmax.f32 %v1120_v33, 0.0 }
 0x384   :  { %v1098_v57 = vpop.xlane.xlu1 %1097 }
 0x385   :  { %v1152_v18 = vadd.f32 1e-05, %v1128_v15 }
 0x386   :  { %v2049_v27 = vpop.xlane.xlu0 %941 }
 0x387   :  { %1393 = vrsqrt.f32 %v1152_v18  ;;  %v1113_v4 = vmul.f32 %v2049_v27, %v2049_v27 }
 0x388   :  { %v2053_v36 = vpop.xlane.xlu1 %944  ;;  %1395 = vrsqrt.f32 %v583_v55 }
 0x389   :  { %v1121_v10 = vsub.f32 %v1095_v61, %v1113_v4  ;;  %v1114_v62 = vmul.f32 %v2053_v36, %v2053_v36  ;;  %v607_v4 = vmul.f32 %v1392_v14, %v575_v37 }
 0x38a   :  { %v1101_v20 = vpop.xlane.xlu0 %1100 }
 0x38b   :  { %v1129_v25 = vmax.f32 %v1121_v10, 0.0  ;;  %v1122_v42 = vsub.f32 %v1098_v57, %v1114_v62  ;;  %v576_v10 = vsub.f32 %v1689_v47, %v2041_v60  ;;  %v1139_v47 = vsub.f32 %v1835_v21, %v2049_v27 }
 0x38c   :  { %v1104_v54 = vpop.xlane.xlu1 %1103  ;;  %v1141_v21 = vsub.f32 %v1838_v23, %v2053_v36 }
 0x38d   :  { %v1153_v22 = vadd.f32 1e-05, %v1129_v25  ;;  %v1130_v28 = vmax.f32 %v1122_v42, 0.0 }
 0x38e   :  { %v2057_v58 = vpop.xlane.xlu0 %947 }
 0x38f   :  { %1397 = vrsqrt.f32 %v1153_v22  ;;  %v1154_v31 = vadd.f32 1e-05, %v1130_v28  ;;  %v1115_v40 = vmul.f32 %v2057_v58, %v2057_v58  ;;  %v608_v28 = vmul.f32 %v1392_v14, %v576_v10 }
 0x390   :  { %v2063_v19 = vpop.xlane.xlu1 %950  ;;  %v1111_v14 = vmul.f32 %v2045_v46, %v2045_v46 }
 0x391   :  { %v1394_v38 = vpop.eup %1393  ;;  %1399 = vrsqrt.f32 %v1154_v31  ;;  %v1123_v56 = vsub.f32 %v1101_v20, %v1115_v40  ;;  %v1116_v39 = vmul.f32 %v2063_v19, %v2063_v19  ;;  %v574_v20 = vsub.f32 %v1674_v34, %v2039_v49 }
 0x392   :  { %v1169_v33 = vmul.f32 %v1394_v38, %v1137_v11  ;;  %v1170_v7 = vmul.f32 %v1394_v38, %v1138_v43  ;;  %v1107_v61 = vpop.xlane.xlu0 %1106  ;;  %v1396_v15 = vpop.eup %1395  ;;  %v1140_v34 = vsub.f32 %v1832_v6, %v2049_v27  ;;  %v1142_v6 = vsub.f32 %v1842_v24, %v2053_v36 }
 0x393   :  { %v1131_v57 = vmax.f32 %v1123_v56, 0.0  ;;  %v1124_v55 = vsub.f32 %v1104_v54, %v1116_v39  ;;  %v605_v41 = vmul.f32 %v1396_v15, %v573_v50  ;;  %v606_v60 = vmul.f32 %v1396_v15, %v574_v20 }
 0x394   :  { %v1185_v52 = vmul.f32 %v1169_v33, %v1955_v3  ;;  %v1186_v51 = vmul.f32 %v1170_v7, %v1955_v3  ;;  %v1110_v18 = vpop.xlane.xlu1 %1109  ;;  %v664_v7 = vmul.f32 %v1965_v13, %v608_v28 }
 0x395   :  { %v1155_v62 = vadd.f32 1e-05, %v1131_v57  ;;  %v1132_v44 = vmax.f32 %v1124_v55, 0.0  ;;  %v662_v28 = vmul.f32 %v1963_v0, %v606_v60 }
 0x396   :  { %v1201_v25 = vadd.f32 %v1185_v52, %v1969_v16  ;;  %v1202_v42 = vadd.f32 %v1186_v51, %v1969_v16  ;;  %v2079_v54 = vpop.xlane.xlu0 %953  ;;  %v663_v16 = vmul.f32 %v1965_v13, %v607_v4 }
 0x397   :  { %1401 = vrsqrt.f32 %v1155_v62  ;;  %v1156_v22 = vadd.f32 1e-05, %v1132_v44  ;;  %v1117_v3 = vmul.f32 %v2079_v54, %v2079_v54 }
 0x398   :  { %1218 = vst [vmem:[#allocation2 + $0x90] sm:$0xff] %v1201_v25  ;;  %1219 = vst [vmem:[#allocation2 + $0x98] sm:$0xff] %v1202_v42  ;;  %v2087_v49 = vpop.xlane.xlu1 %956  ;;  %v1143_v42 = vsub.f32 %v1860_v45, %v2057_v58  ;;  %v1146_v45 = vsub.f32 %v1866_v53, %v2063_v19 }
 0x399   :  { %v1398_v31 = vpop.eup %1397  ;;  %1403 = vrsqrt.f32 %v1156_v22  ;;  %v1125_v40 = vsub.f32 %v1107_v61, %v1117_v3  ;;  %v1118_v11 = vmul.f32 %v2087_v49, %v2087_v49  ;;  %v661_v3 = vmul.f32 %v1963_v0, %v605_v41 }
 0x39a   :  { %v1171_v43 = vmul.f32 %v1398_v31, %v1139_v47  ;;  %v1172_v38 = vmul.f32 %v1398_v31, %v1140_v34  ;;  %v1089_v27 = vpop.xlane.xlu0 %1088 }
 0x39b   :  { %v1400_v56 = vpop.eup %1399  ;;  %v1133_v39 = vmax.f32 %v1125_v40, 0.0  ;;  %v1126_v37 = vsub.f32 %v1110_v18, %v1118_v11  ;;  %v1119_v33 = vsub.f32 %v1089_v27, %v1111_v14  ;;  %v2176_v27 = vld [vmem:[#allocation7_spill] sm:$0xff] }
 0x39c   :  { %v1187_v61 = vmul.f32 %v1171_v43, %v1953_v2  ;;  %v1188_v15 = vmul.f32 %v1172_v38, %v1953_v2  ;;  %v1173_v57 = vmul.f32 %v1400_v56, %v1141_v21  ;;  %v1174_v55 = vmul.f32 %v1400_v56, %v1142_v6  ;;  %v2101_v50 = vpop.permute.xlu1 %702 }
 0x39d   :  { %v1157_v52 = vadd.f32 1e-05, %v1133_v39  ;;  %v1134_v23 = vmax.f32 %v1126_v37, 0.0  ;;  %v1127_v51 = vmax.f32 %v1119_v33, 0.0  ;;  %v719_v24 = vadd.f32 %v2101_v50, %v663_v16 }
 0x39e   :  { %v1203_v36 = vadd.f32 %v1187_v61, %v1971_v63  ;;  %v1204_v18 = vadd.f32 %v1188_v15, %v1971_v63  ;;  %v1189_v4 = vmul.f32 %v1173_v57, %v1959_v8  ;;  %v1190_v10 = vmul.f32 %v1174_v55, %v1959_v8 }
 0x39f   :  { %1405 = vrsqrt.f32 %v1157_v52  ;;  %v1158_v62 = vadd.f32 1e-05, %v1134_v23  ;;  %v1151_v2 = vadd.f32 1e-05, %v1127_v51  ;;  %v720_v44 = vadd.f32 %v2101_v50, %v664_v7  ;;  %735 = vst [vmem:[#allocation2 + $0x70] sm:$0xff] %v719_v24 }
 0x3a0   :  { %1220 = vst [vmem:[#allocation2 + $0xa0] sm:$0xff] %v1203_v36  ;;  %1221 = vst [vmem:[#allocation2 + $0xa8] sm:$0xff] %v1204_v18  ;;  %v1205_v20 = vadd.f32 %v1189_v4, %v1973_v29  ;;  %v1206_v25 = vadd.f32 %v1190_v10, %v1973_v29  ;;  %v1144_v63 = vsub.f32 %v1857_v35, %v2057_v58 }
 0x3a1   :  { %v1402_v22 = vpop.eup %1401  ;;  %v1145_v8 = vsub.f32 %v1863_v48, %v2063_v19  ;;  %1407 = vrsqrt.f32 %v1158_v62  ;;  %736 = vst [vmem:[#allocation2 + $0x78] sm:$0xff] %v720_v44  ;;  %v1148_v38 = vsub.f32 %v1881_v12, %v2079_v54  ;;  %v1150_v56 = vsub.f32 %v2176_v27, %v2087_v49 }
 0x3a2   :  { %1222 = vst [vmem:[#allocation2 + $0xb0] sm:$0xff] %v1205_v20  ;;  %1223 = vst [vmem:[#allocation2 + $0xb8] sm:$0xff] %v1206_v25  ;;  %v1175_v47 = vmul.f32 %v1402_v22, %v1143_v42  ;;  %v1176_v29 = vmul.f32 %v1402_v22, %v1144_v63  ;;  %1409 = vrsqrt.f32 %v1151_v2  ;;  %v698_v34 = vpop.permute.xlu0 %697 }
 0x3a3   :  { %v1404_v35 = vpop.eup %1403  ;;  %v717_v58 = vadd.f32 %v698_v34, %v661_v3  ;;  %v718_v16 = vadd.f32 %v698_v34, %v662_v28 }
 0x3a4   :  { %v1191_v48 = vmul.f32 %v1175_v47, %v1957_v5  ;;  %v1192_v31 = vmul.f32 %v1176_v29, %v1957_v5  ;;  %v1177_v40 = vmul.f32 %v1404_v35, %v1145_v8  ;;  %v1178_v41 = vmul.f32 %v1404_v35, %v1146_v45 }
 0x3a5   :  { %733 = vst [vmem:[#allocation2 + $0x60] sm:$0xff] %v717_v58  ;;  %734 = vst [vmem:[#allocation2 + $0x68] sm:$0xff] %v718_v16  ;;  %v1147_v5 = vsub.f32 %v1884_v26, %v2079_v54  ;;  %v2178_v26 = vld [vmem:[#allocation5_spill] sm:$0xff] }
 0x3a6   :  { %v1207_v60 = vadd.f32 %v1191_v48, %v1975_v30  ;;  %v1208_v11 = vadd.f32 %v1192_v31, %v1975_v30  ;;  %v1193_v14 = vmul.f32 %v1177_v40, %v1961_v9  ;;  %v1194_v53 = vmul.f32 %v1178_v41, %v1961_v9 }
 0x3a7   :  { %v1149_v9 = vsub.f32 %v1887_v17, %v2087_v49  ;;  %v1136_v33 = vsub.f32 %v2178_v26, %v2045_v46 }
 0x3a8   :  { %1224 = vst [vmem:[#allocation2 + $0xc0] sm:$0xff] %v1207_v60  ;;  %1225 = vst [vmem:[#allocation2 + $0xc8] sm:$0xff] %v1208_v11  ;;  %v1209_v19 = vadd.f32 %v1193_v14, %v1977_v59  ;;  %v1210_v43 = vadd.f32 %v1194_v53, %v1977_v59  ;;  %v2177_v59 = vld [vmem:[#allocation6_spill] sm:$0xff] }
 0x3a9   :  { %v1406_v21 = vpop.eup %1405  ;;  %v1135_v37 = vsub.f32 %v2177_v59, %v2045_v46 }
 0x3aa   :  { %1226 = vst [vmem:[#allocation2 + $0xd0] sm:$0xff] %v1209_v19  ;;  %1227 = vst [vmem:[#allocation2 + $0xd8] sm:$0xff] %v1210_v43  ;;  %v1179_v30 = vmul.f32 %v1406_v21, %v1147_v5  ;;  %v1180_v6 = vmul.f32 %v1406_v21, %v1148_v38 }
 0x3ab   :  { %v1408_v39 = vpop.eup %1407 }
 0x3ac   :  { %v1410_v7 = vpop.eup %1409  ;;  %v1181_v12 = vmul.f32 %v1408_v39, %v1149_v9  ;;  %v1182_v54 = vmul.f32 %v1408_v39, %v1150_v56  ;;  %v1195_v61 = vmul.f32 %v1179_v30, %v1963_v0  ;;  %v1196_v15 = vmul.f32 %v1180_v6, %v1963_v0 }
 0x3ad   :  { %v1167_v57 = vmul.f32 %v1410_v7, %v1135_v37  ;;  %v1168_v55 = vmul.f32 %v1410_v7, %v1136_v33 }
 0x3ae   :  { %v1197_v17 = vmul.f32 %v1181_v12, %v1965_v13  ;;  %v1198_v49 = vmul.f32 %v1182_v54, %v1965_v13  ;;  %v1211_v52 = vadd.f32 %v1195_v61, %v698_v34  ;;  %v1212_v23 = vadd.f32 %v1196_v15, %v698_v34 }
 0x3af   :  { %v1183_v51 = vmul.f32 %v1167_v57, %v1951_v1  ;;  %v1184_v46 = vmul.f32 %v1168_v55, %v1951_v1 }
 0x3b0   :  { %v1213_v24 = vadd.f32 %v1197_v17, %v2101_v50  ;;  %v1214_v36 = vadd.f32 %v1198_v49, %v2101_v50  ;;  %1228 = vst [vmem:[#allocation2 + $0xe0] sm:$0xff] %v1211_v52  ;;  %1229 = vst [vmem:[#allocation2 + $0xe8] sm:$0xff] %v1212_v23 }
 0x3b1   :  { %v1199_v0 = vadd.f32 %v1183_v51, %v1967_v32  ;;  %v1200_v18 = vadd.f32 %v1184_v46, %v1967_v32 }
 0x3b2   :  { %1230 = vst [vmem:[#allocation2 + $0xf0] sm:$0xff] %v1213_v24  ;;  %1231 = vst [vmem:[#allocation2 + $0xf8] sm:$0xff] %v1214_v36 }
 0x3b3   :  { %1216 = vst [vmem:[#allocation2 + $0x80] sm:$0xff] %v1199_v0  ;;  %1217 = vst [vmem:[#allocation2 + $0x88] sm:$0xff] %v1200_v18 }
 0x3b4   :  { %1422 = shalt.err (!%p1419_p4)
}
 0x3b5   :  { %s1423_s25 = scalar_lea.hbm %s2169_s6, 4096 }
 0x3b6   :  { %p1424_p5 = scmp.ne.s32.totalorder %s2169_s6, %s1423_s25  ;;  %p1427_p6 = scmp.lt.u32.totalorder %s1423_s25, %s2169_s6 }
 0x3b8   :  { %p1429_p7 = pnand %p1427_p6, %p1424_p5 }
 0x3ba   :  { %1432 = shalt.err (!%p1429_p7)
}
 0x3bb   :  { %s1438_s0 = smov 256   ;;  %s1439_s29 = smov 16  }
 0x3bc   :  { %1243 = dma.vmem_to_hbm [thread:$0]  %s1238_s22, 4096, %s2169_s6, [#allocation3], %s1438_s0, %s1438_s0, %s1439_s29  }
 0x3bd   :  { %1433 = dma.done.wait [#allocation3], 4096  }
 0x3be   :  { %1434 = vsyncadd [#allocation3], 4294963200 }
 0x3bf   :  { %1247 = vsyncpa [#allocation3], 1 }

</bundles_post_ra>
